<compile_context>
chip_gen: v6e
topology: v6e:2x2x1
jax: 0.10.0
libtpu: 0.0.40
codegen_flags: <defaults>
</compile_context>

<pallas_src>
import functools
import math

import jax
import jax.numpy as jnp
from jax import lax
from jax.experimental import pallas as pl
from jax.experimental.pallas import tpu as pltpu


# ------------------------------ Pallas kernel ------------------------------ #

def _fused_attention_kernel(q_ref, k_ref, v_ref, wq_ref, wk_ref, wv_ref,
                            wo_ref, bo_ref, o_ref,
                            kproj_ref, vproj_ref, agg_ref, *,
                            n_heads, d_key, d_value, scale):
    # --- K/V projections: hoisted out of the q loop ------------------------ #
    # They depend only on the batch index, so compute them once per batch
    # (first q tile) into persistent VMEM scratch and reuse for all q tiles.
    @pl.when(pl.program_id(1) == 0)
    def _():
        k = k_ref[0]                                            # (Lk, D)
        v = v_ref[0]                                            # (Lk, D)
        kproj_ref[...] = jnp.dot(
            k, wk_ref[...], preferred_element_type=jnp.float32
        ).astype(kproj_ref.dtype)                               # (Lk, H*E)
        vproj_ref[...] = jnp.dot(
            v, wv_ref[...], preferred_element_type=jnp.float32
        ).astype(vproj_ref.dtype)                               # (Lk, H*Dv)

    # --- Q projection for this tile: all heads in one MXU matmul ----------- #
    q = q_ref[0]                                                # (bq, D)
    # Scale Q (bq x H*E elements) instead of the (bq x Lk) score tiles.
    Q = jnp.dot(q, wq_ref[...],
                preferred_element_type=jnp.float32) * scale     # f32 (bq, H*E)

    cd = kproj_ref.dtype       # MXU-operand dtype (bf16 on the bf16 path)
    K = kproj_ref[...]
    V = vproj_ref[...]

    # Per-head attention.  Softmax math is kept in f32 on all generations
    # (v5e has no bf16 VALU/EUP); bf16 is used strictly for MXU operands.
    # NOTE: d_key < 128 under-fills the MXU contraction on v6e/v7x (2x256^2),
    # and the per-head lane slices below are relayout copies when d_key is
    # not a multiple of 128 — acceptable at small head dims.
    for h in range(n_heads):                                    # small static H
        qh = Q[:, h * d_key:(h + 1) * d_key].astype(cd)         # (bq, E)
        kh = K[:, h * d_key:(h + 1) * d_key]                    # (Lk, E)
        vh = V[:, h * d_value:(h + 1) * d_value]                # (Lk, Dv)

        # scores = qh @ kh^T, contracting on E directly (no K transpose copy).
        s = lax.dot_general(qh, kh, (((1,), (1,)), ((), ())),
                            preferred_element_type=jnp.float32)  # (bq, Lk) f32

        # Numerically stable softmax over keys; divide -> EUP approx recip.
        m = jnp.max(s, axis=-1, keepdims=True)
        e = jnp.exp(s - m)
        inv = pl.reciprocal(jnp.sum(e, axis=-1, keepdims=True), approx=True)
        a = (e * inv).astype(cd)
        # attn_dropout = 0.0 (eval semantics) -> dropout is identity.
        # TODO(synk): training-mode dropout (pltpu.prng_random_bits mask).

        # Write this head's output into the persistent agg slab (no lane-axis
        # concatenate; per-head score/exp temporaries die here).
        agg_ref[:, h * d_value:(h + 1) * d_value] = jnp.dot(
            a, vh, preferred_element_type=jnp.float32)           # (bq, Dv)

    # --- Fused WO projection + bias: lane-dense (d_model) output store ----- #
    out = jnp.dot(agg_ref[...].astype(cd), wo_ref[...],
                  preferred_element_type=jnp.float32)
    out = out + bo_ref[...].astype(jnp.float32)
    o_ref[0] = out.astype(o_ref.dtype)


# --------------------------------- wrapper --------------------------------- #

def full_attention(query, key, value, params, n_heads, *,
                   compute_dtype=jnp.float32, block_q=None):
    wq, wk, wv, wo, bo = (params["wq"], params["wk"], params["wv"],
                          params["wo"], params["bo"])
    B, Lq, D = query.shape
    _, Lk, _ = key.shape
    HE = wq.shape[-1]            # n_heads * d_key
    HDv = wv.shape[-1]           # n_heads * d_value
    d_key = HE // n_heads
    d_value = HDv // n_heads
    d_model = wo.shape[-1]
    scale = 1.0 / math.sqrt(d_key)

    cd = jnp.dtype(compute_dtype)
    if cd != jnp.dtype(jnp.float32):
        # Pre-cast in the WRAPPER so the HBM->VMEM DMA and the VMEM block
        # footprint actually halve (in-kernel casting would still DMA f32).
        query, key, value = (x.astype(cd) for x in (query, key, value))
        wq, wk, wv, wo = (w.astype(cd) for w in (wq, wk, wv, wo))
    # bias stays f32: it is added in the f32 epilogue and is tiny.

    # Query tiling: whole sequence for small Lq, 512-row sublane-aligned tiles
    # otherwise; cdiv grid so awkward Lq never collapses into one huge tile.
    if block_q is None:
        block_q = Lq if Lq <= 512 else 512
    if block_q != Lq:
        block_q = max(8, (min(block_q, Lq) // 8) * 8)
    num_q = pl.cdiv(Lq, block_q)

    kernel = functools.partial(
        _fused_attention_kernel,
        n_heads=n_heads, d_key=d_key, d_value=d_value, scale=scale)

    # Cost estimate consistent with the hoisted kernel (K/V projected once per
    # batch, not once per q tile) and the pre-cast input dtypes.
    flops = (2 * B * Lq * D * HE                       # Q projection
             + 2 * B * Lk * D * HE                     # K projection (1x/batch)
             + 2 * B * Lk * D * HDv                    # V projection (1x/batch)
             + 2 * B * n_heads * Lq * Lk * d_key       # scores
             + 2 * B * n_heads * Lq * Lk * d_value     # A @ V
             + 2 * B * Lq * HDv * d_model)             # WO
    in_bytes = sum(int(x.size) * x.dtype.itemsize
                   for x in (query, key, value, wq, wk, wv, wo, bo))
    bytes_accessed = in_bytes + 4 * B * Lq * d_model

    # VMEM budget derived from the actual blocks/scratch (weights + k/v single
    # buffered); floor 32 MiB, cap 56 MiB (< v7x's 64 MiB physical VMEM).
    itm = cd.itemsize
    vmem_need = (2 * block_q * D * itm                          # q (double buf)
                 + 2 * Lk * D * itm                             # k + v (single)
                 + (2 * D * HE + D * HDv + HDv * d_model) * itm
                 + d_model * 4                                  # weights + bias
                 + 2 * block_q * d_model * 4                    # out (double)
                 + (Lk * HE + Lk * HDv) * itm                   # K/V proj scratch
                 + block_q * HDv * 4)                           # agg scratch
    vmem_limit = int(min(max(2 * vmem_need, 32 * 1024 * 1024),
                         56 * 1024 * 1024))

    def _call(single_buffer_invariants):
        # Grid-invariant (weights/bias) and per-batch (k/v) blocks never
        # change within a batch -> single buffer them to reclaim VMEM.
        single = (dict(pipeline_mode=pl.Buffered(1))
                  if single_buffer_invariants else {})
        return pl.pallas_call(
            kernel,
            out_shape=jax.ShapeDtypeStruct((B, Lq, d_model), jnp.float32),
            grid=(B, num_q),
            in_specs=[
                pl.BlockSpec((1, block_q, D), lambda b, i: (b, i, 0)),       # q
                pl.BlockSpec((1, Lk, D), lambda b, i: (b, 0, 0), **single),  # k
                pl.BlockSpec((1, Lk, D), lambda b, i: (b, 0, 0), **single),  # v
                pl.BlockSpec((D, HE), lambda b, i: (0, 0), **single),        # WQ
                pl.BlockSpec((D, HE), lambda b, i: (0, 0), **single),        # WK
                pl.BlockSpec((D, HDv), lambda b, i: (0, 0), **single),       # WV
                pl.BlockSpec((HDv, d_model), lambda b, i: (0, 0), **single), # WO
                pl.BlockSpec((1, d_model), lambda b, i: (0, 0), **single),   # b
            ],
            out_specs=pl.BlockSpec((1, block_q, d_model),
                                   lambda b, i: (b, i, 0)),
            scratch_shapes=[
                pltpu.VMEM((Lk, HE), cd),                 # projected K (per batch)
                pltpu.VMEM((Lk, HDv), cd),                # projected V (per batch)
                pltpu.VMEM((block_q, HDv), jnp.float32),  # per-tile head outputs
            ],
            compiler_params=pltpu.CompilerParams(
                # q axis is 'arbitrary': K/V scratch written at q==0 is reused
                # by later q tiles of the same batch; batch axis is 'parallel'.
                dimension_semantics=("parallel", "arbitrary"),
                vmem_limit_bytes=vmem_limit),
            cost_estimate=pl.CostEstimate(
                flops=flops,
                transcendentals=B * n_heads * Lq * Lk,
                bytes_accessed=bytes_accessed),
        )(query, key, value, wq, wk, wv, wo, bo)

    try:
        return _call(True)
    except Exception:
        # Fallback for toolchains that reject Buffered(1): default buffering.
        return _call(False)


# ------------------------- reference (pure JAX) ----------------------------- #

def full_attention_ref(query, key, value, params, n_heads):
    wq, wk, wv, wo, bo = (params["wq"], params["wk"], params["wv"],
                          params["wo"], params["bo"])
    B, Lq, _ = query.shape
    _, Lk, _ = key.shape
    E = wq.shape[-1] // n_heads
    Dv = wv.shape[-1] // n_heads
    Q = (query @ wq).reshape(B, Lq, n_heads, E)
    K = (key @ wk).reshape(B, Lk, n_heads, E)
    V = (value @ wv).reshape(B, Lk, n_heads, Dv)
    scale = 1.0 / math.sqrt(E)
    scores = jnp.einsum('blhe,bshe->bhls', Q, K)
    A = jax.nn.softmax(scale * scores, axis=-1)
    agg = jnp.einsum('bhls,bshd->blhd', A, V)
    return agg.reshape(B, Lq, n_heads * Dv) @ wo + bo


# ----------------------------------- main ----------------------------------- #

def init_params(rng, d_model, n_heads, d_key=None, d_value=None):
    d_key = d_key or d_model // n_heads
    d_value = d_value or d_model // n_heads
    kq, kk, kv, ko, kb = jax.random.split(rng, 5)
    # Merged (head-fused) projection weights == transposes of the PyTorch
    # nn.Linear weights, columns in head-major order (matches .view(..., H, -1)).
    wq = 0.1 * jax.random.normal(kq, (d_model, n_heads * d_key), jnp.float32)
    wk = 0.1 * jax.random.normal(kk, (d_model, n_heads * d_key), jnp.float32)
    wv = 0.1 * jax.random.normal(kv, (d_model, n_heads * d_value), jnp.float32)
    wo = 0.1 * jax.random.normal(ko, (n_heads * d_value, d_model), jnp.float32)
    bo = 0.1 * jax.random.normal(kb, (1, d_model), jnp.float32)
    return {"wq": wq, "wk": wk, "wv": wv, "wo": wo, "bo": bo}


if __name__ == "__main__":
    B, Lq, Lk = 2, 16, 16
    d_model, n_heads = 32, 4          # d_key = d_value = 8, attn_dropout = 0.0

    root = jax.random.PRNGKey(0)
    kp, kq, kk, kv = jax.random.split(root, 4)
    params = init_params(kp, d_model, n_heads)

    query = jax.random.normal(kq, (B, Lq, d_model), jnp.float32)
    key = jax.random.normal(kk, (B, Lk, d_model), jnp.float32)
    value = jax.random.normal(kv, (B, Lk, d_model), jnp.float32)

    ref = full_attention_ref(query, key, value, params, n_heads)

    # f32 path, single q tile per batch.
    out = jax.block_until_ready(
        full_attention(query, key, value, params, n_heads))
    assert out.shape == (B, Lq, d_model)
    assert jnp.allclose(out, ref, atol=5e-3, rtol=5e-3)

    # f32 path, two q tiles per batch: exercises the hoisted K/V projection
    # scratch being written once per batch and reused across q tiles.
    out_tiled = jax.block_until_ready(
        full_attention(query, key, value, params, n_heads, block_q=8))
    assert jnp.allclose(out_tiled, ref, atol=5e-3, rtol=5e-3)

    # bf16 MXU-operand path (inputs/weights pre-cast in the wrapper, so DMA
    # bytes really halve), f32 softmax math and f32 accumulation.
    out_bf16 = jax.block_until_ready(
        full_attention(query, key, value, params, n_heads,
                       compute_dtype=jnp.bfloat16, block_q=8))
    assert out_bf16.shape == (B, Lq, d_model)
    assert jnp.allclose(out_bf16, ref, atol=1e-1, rtol=1e-1)

    print("KERNEL_OK")
</pallas_src>

<mosaic_0001>
module attributes {stable_mosaic.version = 11 : i64} {
  func.func @_fused_attention_kernel(%arg0: i32, %arg1: i32, %arg2: memref<1x16x32xf32, #tpu.memory_space<vmem>>, %arg3: memref<1x16x32xf32, #tpu.memory_space<vmem>>, %arg4: memref<1x16x32xf32, #tpu.memory_space<vmem>>, %arg5: memref<32x32xf32, #tpu.memory_space<vmem>>, %arg6: memref<32x32xf32, #tpu.memory_space<vmem>>, %arg7: memref<32x32xf32, #tpu.memory_space<vmem>>, %arg8: memref<32x32xf32, #tpu.memory_space<vmem>>, %arg9: memref<1x32xf32, #tpu.memory_space<vmem>>, %arg10: memref<1x16x32xf32, #tpu.memory_space<vmem>>, %arg11: memref<16x32xf32, #tpu.memory_space<vmem>>, %arg12: memref<16x32xf32, #tpu.memory_space<vmem>>, %arg13: memref<16x32xf32, #tpu.memory_space<vmem>>) attributes {dimension_semantics = [#tpu.dimension_semantics<parallel>, #tpu.dimension_semantics<arbitrary>], iteration_bounds = array<i64: 2, 1>, scalar_prefetch = 0 : i64, scratch_operands = 3 : i64, tpu.core_type = #tpu.core_type<tc>, window_params = [{transform_indices = @transform_0, window_bounds = array<i64: 1, 16, 32>}, {pipeline_mode = #tpu.pipeline_mode<synchronous>, transform_indices = @transform_1, window_bounds = array<i64: 1, 16, 32>}, {pipeline_mode = #tpu.pipeline_mode<synchronous>, transform_indices = @transform_2, window_bounds = array<i64: 1, 16, 32>}, {pipeline_mode = #tpu.pipeline_mode<synchronous>, transform_indices = @transform_3, window_bounds = array<i64: 32, 32>}, {pipeline_mode = #tpu.pipeline_mode<synchronous>, transform_indices = @transform_4, window_bounds = array<i64: 32, 32>}, {pipeline_mode = #tpu.pipeline_mode<synchronous>, transform_indices = @transform_5, window_bounds = array<i64: 32, 32>}, {pipeline_mode = #tpu.pipeline_mode<synchronous>, transform_indices = @transform_6, window_bounds = array<i64: 32, 32>}, {pipeline_mode = #tpu.pipeline_mode<synchronous>, transform_indices = @transform_7, window_bounds = array<i64: 1, 32>}, {transform_indices = @transform_8, window_bounds = array<i64: 1, 16, 32>}]} {
    %c0_i32 = arith.constant 0 : i32
    %0 = arith.cmpi eq, %arg1, %c0_i32 : i32
    %1 = arith.extui %0 : i1 to i32
    %c0_i32_0 = arith.constant 0 : i32
    %2 = arith.cmpi ne, %1, %c0_i32_0 : i32
    scf.if %2 {
      %c0_41 = arith.constant 0 : index
      %c0_42 = arith.constant 0 : index
      %c0_43 = arith.constant 0 : index
      %84 = vector.load %arg3[%c0_41, %c0_42, %c0_43] : memref<1x16x32xf32, #tpu.memory_space<vmem>>, vector<1x16x32xf32>
      %85 = vector.shape_cast %84 : vector<1x16x32xf32> to vector<16x32xf32>
      %c0_44 = arith.constant 0 : index
      %c0_45 = arith.constant 0 : index
      %c0_46 = arith.constant 0 : index
      %86 = vector.load %arg4[%c0_44, %c0_45, %c0_46] : memref<1x16x32xf32, #tpu.memory_space<vmem>>, vector<1x16x32xf32>
      %87 = vector.shape_cast %86 : vector<1x16x32xf32> to vector<16x32xf32>
      %c0_47 = arith.constant 0 : index
      %c0_48 = arith.constant 0 : index
      %88 = vector.load %arg6[%c0_47, %c0_48] : memref<32x32xf32, #tpu.memory_space<vmem>>, vector<32x32xf32>
      %cst_49 = arith.constant dense<0.000000e+00> : vector<16x32xf32>
      %89 = tpu.matmul %85, %88, %cst_49 {dimension_numbers = #tpu.dot_dimension_numbers<[1], [0], [0], [1], [0, 0, 1, 1], [], []>} : vector<16x32xf32>, vector<32x32xf32>, vector<16x32xf32> -> vector<16x32xf32>
      %c0_50 = arith.constant 0 : index
      %c0_51 = arith.constant 0 : index
      %90 = vector.load %arg11[%c0_50, %c0_51] : memref<16x32xf32, #tpu.memory_space<vmem>>, vector<16x32xf32>
      tpu.vector_store %arg11[%c0_50, %c0_51], %89 {strides = array<i32>} : memref<16x32xf32, #tpu.memory_space<vmem>>, vector<16x32xf32>,
      %c0_52 = arith.constant 0 : index
      %c0_53 = arith.constant 0 : index
      %91 = vector.load %arg7[%c0_52, %c0_53] : memref<32x32xf32, #tpu.memory_space<vmem>>, vector<32x32xf32>
      %cst_54 = arith.constant dense<0.000000e+00> : vector<16x32xf32>
      %92 = tpu.matmul %87, %91, %cst_54 {dimension_numbers = #tpu.dot_dimension_numbers<[1], [0], [0], [1], [0, 0, 1, 1], [], []>} : vector<16x32xf32>, vector<32x32xf32>, vector<16x32xf32> -> vector<16x32xf32>
      %c0_55 = arith.constant 0 : index
      %c0_56 = arith.constant 0 : index
      %93 = vector.load %arg12[%c0_55, %c0_56] : memref<16x32xf32, #tpu.memory_space<vmem>>, vector<16x32xf32>
      tpu.vector_store %arg12[%c0_55, %c0_56], %92 {strides = array<i32>} : memref<16x32xf32, #tpu.memory_space<vmem>>, vector<16x32xf32>,
    } else {
    }
    %c0 = arith.constant 0 : index
    %c0_1 = arith.constant 0 : index
    %c0_2 = arith.constant 0 : index
    %3 = vector.load %arg2[%c0, %c0_1, %c0_2] : memref<1x16x32xf32, #tpu.memory_space<vmem>>, vector<1x16x32xf32>
    %4 = vector.shape_cast %3 : vector<1x16x32xf32> to vector<16x32xf32>
    %c0_3 = arith.constant 0 : index
    %c0_4 = arith.constant 0 : index
    %5 = vector.load %arg5[%c0_3, %c0_4] : memref<32x32xf32, #tpu.memory_space<vmem>>, vector<32x32xf32>
    %cst = arith.constant dense<0.000000e+00> : vector<16x32xf32>
    %6 = tpu.matmul %4, %5, %cst {dimension_numbers = #tpu.dot_dimension_numbers<[1], [0], [0], [1], [0, 0, 1, 1], [], []>} : vector<16x32xf32>, vector<32x32xf32>, vector<16x32xf32> -> vector<16x32xf32>
    %cst_5 = arith.constant 0.353553385 : f32
    %7 = vector.broadcast %cst_5 : f32 to vector<16x32xf32>
    %8 = arith.mulf %6, %7 : vector<16x32xf32>
    %c0_6 = arith.constant 0 : index
    %c0_7 = arith.constant 0 : index
    %9 = vector.load %arg11[%c0_6, %c0_7] : memref<16x32xf32, #tpu.memory_space<vmem>>, vector<16x32xf32>
    %c0_8 = arith.constant 0 : index
    %c0_9 = arith.constant 0 : index
    %10 = vector.load %arg12[%c0_8, %c0_9] : memref<16x32xf32, #tpu.memory_space<vmem>>, vector<16x32xf32>
    %11 = vector.extract_strided_slice %8 {offsets = [0, 0], sizes = [16, 8], strides = [1, 1]} : vector<16x32xf32> to vector<16x8xf32>
    %12 = vector.extract_strided_slice %9 {offsets = [0, 0], sizes = [16, 8], strides = [1, 1]} : vector<16x32xf32> to vector<16x8xf32>
    %13 = vector.extract_strided_slice %10 {offsets = [0, 0], sizes = [16, 8], strides = [1, 1]} : vector<16x32xf32> to vector<16x8xf32>
    %cst_10 = arith.constant dense<0.000000e+00> : vector<16x16xf32>
    %14 = tpu.matmul %11, %12, %cst_10 {dimension_numbers = #tpu.dot_dimension_numbers<[1], [1], [0], [0], [0, 0, 1, 0], [], []>} : vector<16x8xf32>, vector<16x8xf32>, vector<16x16xf32> -> vector<16x16xf32>
    %cst_11 = arith.constant dense<0xFF800000> : vector<16xf32>
    %15 = vector.multi_reduction <maximumf>, %14, %cst_11 [1] : vector<16x16xf32> to vector<16xf32>
    %16 = vector.shape_cast %15 : vector<16xf32> to vector<16x1xf32>
    %17 = vector.broadcast %16 : vector<16x1xf32> to vector<16x16xf32>
    %18 = arith.subf %14, %17 : vector<16x16xf32>
    %19 = math.exp %18 : vector<16x16xf32>
    %cst_12 = arith.constant dense<0.000000e+00> : vector<16xf32>
    %20 = vector.multi_reduction <add>, %19, %cst_12 [1] : vector<16x16xf32> to vector<16xf32>
    %21 = vector.shape_cast %20 : vector<16xf32> to vector<16x1xf32>
    %22 = tpu.reciprocal %21 {approx = true} : vector<16x1xf32> -> vector<16x1xf32>
    %23 = vector.broadcast %22 : vector<16x1xf32> to vector<16x16xf32>
    %24 = arith.mulf %19, %23 : vector<16x16xf32>
    %cst_13 = arith.constant dense<0.000000e+00> : vector<16x8xf32>
    %25 = tpu.matmul %24, %13, %cst_13 {dimension_numbers = #tpu.dot_dimension_numbers<[1], [0], [0], [1], [0, 0, 1, 1], [], []>} : vector<16x16xf32>, vector<16x8xf32>, vector<16x8xf32> -> vector<16x8xf32>
    %c0_14 = arith.constant 0 : index
    %c0_15 = arith.constant 0 : index
    %26 = vector.load %arg13[%c0_14, %c0_15] : memref<16x32xf32, #tpu.memory_space<vmem>>, vector<16x8xf32>
    tpu.vector_store %arg13[%c0_14, %c0_15], %25 {strides = array<i32>} : memref<16x32xf32, #tpu.memory_space<vmem>>, vector<16x8xf32>,
    %27 = vector.extract_strided_slice %8 {offsets = [0, 8], sizes = [16, 8], strides = [1, 1]} : vector<16x32xf32> to vector<16x8xf32>
    %28 = vector.extract_strided_slice %9 {offsets = [0, 8], sizes = [16, 8], strides = [1, 1]} : vector<16x32xf32> to vector<16x8xf32>
    %29 = vector.extract_strided_slice %10 {offsets = [0, 8], sizes = [16, 8], strides = [1, 1]} : vector<16x32xf32> to vector<16x8xf32>
    %cst_16 = arith.constant dense<0.000000e+00> : vector<16x16xf32>
    %30 = tpu.matmul %27, %28, %cst_16 {dimension_numbers = #tpu.dot_dimension_numbers<[1], [1], [0], [0], [0, 0, 1, 0], [], []>} : vector<16x8xf32>, vector<16x8xf32>, vector<16x16xf32> -> vector<16x16xf32>
    %cst_17 = arith.constant dense<0xFF800000> : vector<16xf32>
    %31 = vector.multi_reduction <maximumf>, %30, %cst_17 [1] : vector<16x16xf32> to vector<16xf32>
    %32 = vector.shape_cast %31 : vector<16xf32> to vector<16x1xf32>
    %33 = vector.broadcast %32 : vector<16x1xf32> to vector<16x16xf32>
    %34 = arith.subf %30, %33 : vector<16x16xf32>
    %35 = math.exp %34 : vector<16x16xf32>
    %cst_18 = arith.constant dense<0.000000e+00> : vector<16xf32>
    %36 = vector.multi_reduction <add>, %35, %cst_18 [1] : vector<16x16xf32> to vector<16xf32>
    %37 = vector.shape_cast %36 : vector<16xf32> to vector<16x1xf32>
    %38 = tpu.reciprocal %37 {approx = true} : vector<16x1xf32> -> vector<16x1xf32>
    %39 = vector.broadcast %38 : vector<16x1xf32> to vector<16x16xf32>
    %40 = arith.mulf %35, %39 : vector<16x16xf32>
    %cst_19 = arith.constant dense<0.000000e+00> : vector<16x8xf32>
    %41 = tpu.matmul %40, %29, %cst_19 {dimension_numbers = #tpu.dot_dimension_numbers<[1], [0], [0], [1], [0, 0, 1, 1], [], []>} : vector<16x16xf32>, vector<16x8xf32>, vector<16x8xf32> -> vector<16x8xf32>
    %c0_20 = arith.constant 0 : index
    %c8 = arith.constant 8 : index
    %42 = vector.load %arg13[%c0_20, %c8] : memref<16x32xf32, #tpu.memory_space<vmem>>, vector<16x8xf32>
    tpu.vector_store %arg13[%c0_20, %c8], %41 {strides = array<i32>} : memref<16x32xf32, #tpu.memory_space<vmem>>, vector<16x8xf32>,
    %43 = vector.extract_strided_slice %8 {offsets = [0, 16], sizes = [16, 8], strides = [1, 1]} : vector<16x32xf32> to vector<16x8xf32>
    %44 = vector.extract_strided_slice %9 {offsets = [0, 16], sizes = [16, 8], strides = [1, 1]} : vector<16x32xf32> to vector<16x8xf32>
    %45 = vector.extract_strided_slice %10 {offsets = [0, 16], sizes = [16, 8], strides = [1, 1]} : vector<16x32xf32> to vector<16x8xf32>
    %cst_21 = arith.constant dense<0.000000e+00> : vector<16x16xf32>
    %46 = tpu.matmul %43, %44, %cst_21 {dimension_numbers = #tpu.dot_dimension_numbers<[1], [1], [0], [0], [0, 0, 1, 0], [], []>} : vector<16x8xf32>, vector<16x8xf32>, vector<16x16xf32> -> vector<16x16xf32>
    %cst_22 = arith.constant dense<0xFF800000> : vector<16xf32>
    %47 = vector.multi_reduction <maximumf>, %46, %cst_22 [1] : vector<16x16xf32> to vector<16xf32>
    %48 = vector.shape_cast %47 : vector<16xf32> to vector<16x1xf32>
    %49 = vector.broadcast %48 : vector<16x1xf32> to vector<16x16xf32>
    %50 = arith.subf %46, %49 : vector<16x16xf32>
    %51 = math.exp %50 : vector<16x16xf32>
    %cst_23 = arith.constant dense<0.000000e+00> : vector<16xf32>
    %52 = vector.multi_reduction <add>, %51, %cst_23 [1] : vector<16x16xf32> to vector<16xf32>
    %53 = vector.shape_cast %52 : vector<16xf32> to vector<16x1xf32>
    %54 = tpu.reciprocal %53 {approx = true} : vector<16x1xf32> -> vector<16x1xf32>
    %55 = vector.broadcast %54 : vector<16x1xf32> to vector<16x16xf32>
    %56 = arith.mulf %51, %55 : vector<16x16xf32>
    %cst_24 = arith.constant dense<0.000000e+00> : vector<16x8xf32>
    %57 = tpu.matmul %56, %45, %cst_24 {dimension_numbers = #tpu.dot_dimension_numbers<[1], [0], [0], [1], [0, 0, 1, 1], [], []>} : vector<16x16xf32>, vector<16x8xf32>, vector<16x8xf32> -> vector<16x8xf32>
    %c0_25 = arith.constant 0 : index
    %c16 = arith.constant 16 : index
    %58 = vector.load %arg13[%c0_25, %c16] : memref<16x32xf32, #tpu.memory_space<vmem>>, vector<16x8xf32>
    tpu.vector_store %arg13[%c0_25, %c16], %57 {strides = array<i32>} : memref<16x32xf32, #tpu.memory_space<vmem>>, vector<16x8xf32>,
    %59 = vector.extract_strided_slice %8 {offsets = [0, 24], sizes = [16, 8], strides = [1, 1]} : vector<16x32xf32> to vector<16x8xf32>
    %60 = vector.extract_strided_slice %9 {offsets = [0, 24], sizes = [16, 8], strides = [1, 1]} : vector<16x32xf32> to vector<16x8xf32>
    %61 = vector.extract_strided_slice %10 {offsets = [0, 24], sizes = [16, 8], strides = [1, 1]} : vector<16x32xf32> to vector<16x8xf32>
    %cst_26 = arith.constant dense<0.000000e+00> : vector<16x16xf32>
    %62 = tpu.matmul %59, %60, %cst_26 {dimension_numbers = #tpu.dot_dimension_numbers<[1], [1], [0], [0], [0, 0, 1, 0], [], []>} : vector<16x8xf32>, vector<16x8xf32>, vector<16x16xf32> -> vector<16x16xf32>
    %cst_27 = arith.constant dense<0xFF800000> : vector<16xf32>
    %63 = vector.multi_reduction <maximumf>, %62, %cst_27 [1] : vector<16x16xf32> to vector<16xf32>
    %64 = vector.shape_cast %63 : vector<16xf32> to vector<16x1xf32>
    %65 = vector.broadcast %64 : vector<16x1xf32> to vector<16x16xf32>
    %66 = arith.subf %62, %65 : vector<16x16xf32>
    %67 = math.exp %66 : vector<16x16xf32>
    %cst_28 = arith.constant dense<0.000000e+00> : vector<16xf32>
    %68 = vector.multi_reduction <add>, %67, %cst_28 [1] : vector<16x16xf32> to vector<16xf32>
    %69 = vector.shape_cast %68 : vector<16xf32> to vector<16x1xf32>
    %70 = tpu.reciprocal %69 {approx = true} : vector<16x1xf32> -> vector<16x1xf32>
    %71 = vector.broadcast %70 : vector<16x1xf32> to vector<16x16xf32>
    %72 = arith.mulf %67, %71 : vector<16x16xf32>
    %cst_29 = arith.constant dense<0.000000e+00> : vector<16x8xf32>
    %73 = tpu.matmul %72, %61, %cst_29 {dimension_numbers = #tpu.dot_dimension_numbers<[1], [0], [0], [1], [0, 0, 1, 1], [], []>} : vector<16x16xf32>, vector<16x8xf32>, vector<16x8xf32> -> vector<16x8xf32>
    %c0_30 = arith.constant 0 : index
    %c24 = arith.constant 24 : index
    %74 = vector.load %arg13[%c0_30, %c24] : memref<16x32xf32, #tpu.memory_space<vmem>>, vector<16x8xf32>
    tpu.vector_store %arg13[%c0_30, %c24], %73 {strides = array<i32>} : memref<16x32xf32, #tpu.memory_space<vmem>>, vector<16x8xf32>,
    %c0_31 = arith.constant 0 : index
    %c0_32 = arith.constant 0 : index
    %75 = vector.load %arg13[%c0_31, %c0_32] : memref<16x32xf32, #tpu.memory_space<vmem>>, vector<16x32xf32>
    %c0_33 = arith.constant 0 : index
    %c0_34 = arith.constant 0 : index
    %76 = vector.load %arg8[%c0_33, %c0_34] : memref<32x32xf32, #tpu.memory_space<vmem>>, vector<32x32xf32>
    %cst_35 = arith.constant dense<0.000000e+00> : vector<16x32xf32>
    %77 = tpu.matmul %75, %76, %cst_35 {dimension_numbers = #tpu.dot_dimension_numbers<[1], [0], [0], [1], [0, 0, 1, 1], [], []>} : vector<16x32xf32>, vector<32x32xf32>, vector<16x32xf32> -> vector<16x32xf32>
    %c0_36 = arith.constant 0 : index
    %c0_37 = arith.constant 0 : index
    %78 = vector.load %arg9[%c0_36, %c0_37] : memref<1x32xf32, #tpu.memory_space<vmem>>, vector<1x32xf32>
    %79 = vector.broadcast %78 : vector<1x32xf32> to vector<16x32xf32>
    %80 = arith.addf %77, %79 : vector<16x32xf32>
    %c0_38 = arith.constant 0 : index
    %c0_39 = arith.constant 0 : index
    %c0_40 = arith.constant 0 : index
    %81 = vector.load %arg10[%c0_38, %c0_39, %c0_40] : memref<1x16x32xf32, #tpu.memory_space<vmem>>, vector<1x16x32xf32>
    %82 = vector.shape_cast %81 : vector<1x16x32xf32> to vector<16x32xf32>
    %83 = vector.shape_cast %80 : vector<16x32xf32> to vector<1x16x32xf32>
    tpu.vector_store %arg10[%c0_38, %c0_39, %c0_40], %83 {strides = array<i32>} : memref<1x16x32xf32, #tpu.memory_space<vmem>>, vector<1x16x32xf32>,
    return
  }
  func.func @transform_0(%arg0: i32, %arg1: i32) -> (i32, i32, i32) {
    %c0_i32 = arith.constant 0 : i32
    %c0_i32_0 = arith.constant 0 : i32
    return %arg0, %arg1, %c0_i32 : i32, i32, i32
  }
  func.func @transform_1(%arg0: i32, %arg1: i32) -> (i32, i32, i32) {
    %c0_i32 = arith.constant 0 : i32
    %c0_i32_0 = arith.constant 0 : i32
    %c0_i32_1 = arith.constant 0 : i32
    return %arg0, %c0_i32, %c0_i32_0 : i32, i32, i32
  }
  func.func @transform_2(%arg0: i32, %arg1: i32) -> (i32, i32, i32) {
    %c0_i32 = arith.constant 0 : i32
    %c0_i32_0 = arith.constant 0 : i32
    %c0_i32_1 = arith.constant 0 : i32
    return %arg0, %c0_i32, %c0_i32_0 : i32, i32, i32
  }
  func.func @transform_3(%arg0: i32, %arg1: i32) -> (i32, i32) {
    %c0_i32 = arith.constant 0 : i32
    %c0_i32_0 = arith.constant 0 : i32
    %c0_i32_1 = arith.constant 0 : i32
    return %c0_i32, %c0_i32_0 : i32, i32
  }
  func.func @transform_4(%arg0: i32, %arg1: i32) -> (i32, i32) {
    %c0_i32 = arith.constant 0 : i32
    %c0_i32_0 = arith.constant 0 : i32
    %c0_i32_1 = arith.constant 0 : i32
    return %c0_i32, %c0_i32_0 : i32, i32
  }
  func.func @transform_5(%arg0: i32, %arg1: i32) -> (i32, i32) {
    %c0_i32 = arith.constant 0 : i32
    %c0_i32_0 = arith.constant 0 : i32
    %c0_i32_1 = arith.constant 0 : i32
    return %c0_i32, %c0_i32_0 : i32, i32
  }
  func.func @transform_6(%arg0: i32, %arg1: i32) -> (i32, i32) {
    %c0_i32 = arith.constant 0 : i32
    %c0_i32_0 = arith.constant 0 : i32
    %c0_i32_1 = arith.constant 0 : i32
    return %c0_i32, %c0_i32_0 : i32, i32
  }
  func.func @transform_7(%arg0: i32, %arg1: i32) -> (i32, i32) {
    %c0_i32 = arith.constant 0 : i32
    %c0_i32_0 = arith.constant 0 : i32
    %c0_i32_1 = arith.constant 0 : i32
    return %c0_i32, %c0_i32_0 : i32, i32
  }
  func.func @transform_8(%arg0: i32, %arg1: i32) -> (i32, i32, i32) {
    %c0_i32 = arith.constant 0 : i32
    %c0_i32_0 = arith.constant 0 : i32
    return %arg0, %arg1, %c0_i32 : i32, i32, i32
  }
}

module attributes {stable_mosaic.version = 11 : i64} {
  func.func @_fused_attention_kernel(%arg0: i32, %arg1: i32, %arg2: memref<1x16x32xf32, #tpu.memory_space<vmem>>, %arg3: memref<1x16x32xf32, #tpu.memory_space<vmem>>, %arg4: memref<1x16x32xf32, #tpu.memory_space<vmem>>, %arg5: memref<32x32xf32, #tpu.memory_space<vmem>>, %arg6: memref<32x32xf32, #tpu.memory_space<vmem>>, %arg7: memref<32x32xf32, #tpu.memory_space<vmem>>, %arg8: memref<32x32xf32, #tpu.memory_space<vmem>>, %arg9: memref<1x32xf32, #tpu.memory_space<vmem>>, %arg10: memref<1x16x32xf32, #tpu.memory_space<vmem>>, %arg11: memref<16x32xf32, #tpu.memory_space<vmem>>, %arg12: memref<16x32xf32, #tpu.memory_space<vmem>>, %arg13: memref<16x32xf32, #tpu.memory_space<vmem>>) attributes {dimension_semantics = [#tpu.dimension_semantics<parallel>, #tpu.dimension_semantics<arbitrary>], iteration_bounds = array<i64: 2, 1>, scalar_prefetch = 0 : i64, scratch_operands = 3 : i64, tpu.core_type = #tpu.core_type<tc>, window_params = [{transform_indices = @transform_0, window_bounds = array<i64: 1, 16, 32>}, {transform_indices = @transform_1, window_bounds = array<i64: 1, 16, 32>}, {transform_indices = @transform_2, window_bounds = array<i64: 1, 16, 32>}, {pipeline_mode = #tpu.pipeline_mode<synchronous>, transform_indices = @transform_3, window_bounds = array<i64: 32, 32>}, {pipeline_mode = #tpu.pipeline_mode<synchronous>, transform_indices = @transform_4, window_bounds = array<i64: 32, 32>}, {pipeline_mode = #tpu.pipeline_mode<synchronous>, transform_indices = @transform_5, window_bounds = array<i64: 32, 32>}, {pipeline_mode = #tpu.pipeline_mode<synchronous>, transform_indices = @transform_6, window_bounds = array<i64: 32, 32>}, {pipeline_mode = #tpu.pipeline_mode<synchronous>, transform_indices = @transform_7, window_bounds = array<i64: 1, 32>}, {transform_indices = @transform_8, window_bounds = array<i64: 1, 16, 32>}]} {
    %c0_i32 = arith.constant 0 : i32
    %0 = arith.cmpi eq, %arg1, %c0_i32 : i32
    %1 = arith.extui %0 : i1 to i32
    %c0_i32_0 = arith.constant 0 : i32
    %2 = arith.cmpi ne, %1, %c0_i32_0 : i32
    scf.if %2 {
      %c0_41 = arith.constant 0 : index
      %c0_42 = arith.constant 0 : index
      %c0_43 = arith.constant 0 : index
      %84 = vector.load %arg3[%c0_41, %c0_42, %c0_43] : memref<1x16x32xf32, #tpu.memory_space<vmem>>, vector<1x16x32xf32>
      %85 = vector.shape_cast %84 : vector<1x16x32xf32> to vector<16x32xf32>
      %c0_44 = arith.constant 0 : index
      %c0_45 = arith.constant 0 : index
      %c0_46 = arith.constant 0 : index
      %86 = vector.load %arg4[%c0_44, %c0_45, %c0_46] : memref<1x16x32xf32, #tpu.memory_space<vmem>>, vector<1x16x32xf32>
      %87 = vector.shape_cast %86 : vector<1x16x32xf32> to vector<16x32xf32>
      %c0_47 = arith.constant 0 : index
      %c0_48 = arith.constant 0 : index
      %88 = vector.load %arg6[%c0_47, %c0_48] : memref<32x32xf32, #tpu.memory_space<vmem>>, vector<32x32xf32>
      %cst_49 = arith.constant dense<0.000000e+00> : vector<16x32xf32>
      %89 = tpu.matmul %85, %88, %cst_49 {dimension_numbers = #tpu.dot_dimension_numbers<[1], [0], [0], [1], [0, 0, 1, 1], [], []>} : vector<16x32xf32>, vector<32x32xf32>, vector<16x32xf32> -> vector<16x32xf32>
      %c0_50 = arith.constant 0 : index
      %c0_51 = arith.constant 0 : index
      %90 = vector.load %arg11[%c0_50, %c0_51] : memref<16x32xf32, #tpu.memory_space<vmem>>, vector<16x32xf32>
      tpu.vector_store %arg11[%c0_50, %c0_51], %89 {strides = array<i32>} : memref<16x32xf32, #tpu.memory_space<vmem>>, vector<16x32xf32>,
      %c0_52 = arith.constant 0 : index
      %c0_53 = arith.constant 0 : index
      %91 = vector.load %arg7[%c0_52, %c0_53] : memref<32x32xf32, #tpu.memory_space<vmem>>, vector<32x32xf32>
      %cst_54 = arith.constant dense<0.000000e+00> : vector<16x32xf32>
      %92 = tpu.matmul %87, %91, %cst_54 {dimension_numbers = #tpu.dot_dimension_numbers<[1], [0], [0], [1], [0, 0, 1, 1], [], []>} : vector<16x32xf32>, vector<32x32xf32>, vector<16x32xf32> -> vector<16x32xf32>
      %c0_55 = arith.constant 0 : index
      %c0_56 = arith.constant 0 : index
      %93 = vector.load %arg12[%c0_55, %c0_56] : memref<16x32xf32, #tpu.memory_space<vmem>>, vector<16x32xf32>
      tpu.vector_store %arg12[%c0_55, %c0_56], %92 {strides = array<i32>} : memref<16x32xf32, #tpu.memory_space<vmem>>, vector<16x32xf32>,
    } else {
    }
    %c0 = arith.constant 0 : index
    %c0_1 = arith.constant 0 : index
    %c0_2 = arith.constant 0 : index
    %3 = vector.load %arg2[%c0, %c0_1, %c0_2] : memref<1x16x32xf32, #tpu.memory_space<vmem>>, vector<1x16x32xf32>
    %4 = vector.shape_cast %3 : vector<1x16x32xf32> to vector<16x32xf32>
    %c0_3 = arith.constant 0 : index
    %c0_4 = arith.constant 0 : index
    %5 = vector.load %arg5[%c0_3, %c0_4] : memref<32x32xf32, #tpu.memory_space<vmem>>, vector<32x32xf32>
    %cst = arith.constant dense<0.000000e+00> : vector<16x32xf32>
    %6 = tpu.matmul %4, %5, %cst {dimension_numbers = #tpu.dot_dimension_numbers<[1], [0], [0], [1], [0, 0, 1, 1], [], []>} : vector<16x32xf32>, vector<32x32xf32>, vector<16x32xf32> -> vector<16x32xf32>
    %cst_5 = arith.constant 0.353553385 : f32
    %7 = vector.broadcast %cst_5 : f32 to vector<16x32xf32>
    %8 = arith.mulf %6, %7 : vector<16x32xf32>
    %c0_6 = arith.constant 0 : index
    %c0_7 = arith.constant 0 : index
    %9 = vector.load %arg11[%c0_6, %c0_7] : memref<16x32xf32, #tpu.memory_space<vmem>>, vector<16x32xf32>
    %c0_8 = arith.constant 0 : index
    %c0_9 = arith.constant 0 : index
    %10 = vector.load %arg12[%c0_8, %c0_9] : memref<16x32xf32, #tpu.memory_space<vmem>>, vector<16x32xf32>
    %11 = vector.extract_strided_slice %8 {offsets = [0, 0], sizes = [16, 8], strides = [1, 1]} : vector<16x32xf32> to vector<16x8xf32>
    %12 = vector.extract_strided_slice %9 {offsets = [0, 0], sizes = [16, 8], strides = [1, 1]} : vector<16x32xf32> to vector<16x8xf32>
    %13 = vector.extract_strided_slice %10 {offsets = [0, 0], sizes = [16, 8], strides = [1, 1]} : vector<16x32xf32> to vector<16x8xf32>
    %cst_10 = arith.constant dense<0.000000e+00> : vector<16x16xf32>
    %14 = tpu.matmul %11, %12, %cst_10 {dimension_numbers = #tpu.dot_dimension_numbers<[1], [1], [0], [0], [0, 0, 1, 0], [], []>} : vector<16x8xf32>, vector<16x8xf32>, vector<16x16xf32> -> vector<16x16xf32>
    %cst_11 = arith.constant dense<0xFF800000> : vector<16xf32>
    %15 = vector.multi_reduction <maximumf>, %14, %cst_11 [1] : vector<16x16xf32> to vector<16xf32>
    %16 = vector.shape_cast %15 : vector<16xf32> to vector<16x1xf32>
    %17 = vector.broadcast %16 : vector<16x1xf32> to vector<16x16xf32>
    %18 = arith.subf %14, %17 : vector<16x16xf32>
    %19 = math.exp %18 : vector<16x16xf32>
    %cst_12 = arith.constant dense<0.000000e+00> : vector<16xf32>
    %20 = vector.multi_reduction <add>, %19, %cst_12 [1] : vector<16x16xf32> to vector<16xf32>
    %21 = vector.shape_cast %20 : vector<16xf32> to vector<16x1xf32>
    %22 = tpu.reciprocal %21 {approx = true} : vector<16x1xf32> -> vector<16x1xf32>
    %23 = vector.broadcast %22 : vector<16x1xf32> to vector<16x16xf32>
    %24 = arith.mulf %19, %23 : vector<16x16xf32>
    %cst_13 = arith.constant dense<0.000000e+00> : vector<16x8xf32>
    %25 = tpu.matmul %24, %13, %cst_13 {dimension_numbers = #tpu.dot_dimension_numbers<[1], [0], [0], [1], [0, 0, 1, 1], [], []>} : vector<16x16xf32>, vector<16x8xf32>, vector<16x8xf32> -> vector<16x8xf32>
    %c0_14 = arith.constant 0 : index
    %c0_15 = arith.constant 0 : index
    %26 = vector.load %arg13[%c0_14, %c0_15] : memref<16x32xf32, #tpu.memory_space<vmem>>, vector<16x8xf32>
    tpu.vector_store %arg13[%c0_14, %c0_15], %25 {strides = array<i32>} : memref<16x32xf32, #tpu.memory_space<vmem>>, vector<16x8xf32>,
    %27 = vector.extract_strided_slice %8 {offsets = [0, 8], sizes = [16, 8], strides = [1, 1]} : vector<16x32xf32> to vector<16x8xf32>
    %28 = vector.extract_strided_slice %9 {offsets = [0, 8], sizes = [16, 8], strides = [1, 1]} : vector<16x32xf32> to vector<16x8xf32>
    %29 = vector.extract_strided_slice %10 {offsets = [0, 8], sizes = [16, 8], strides = [1, 1]} : vector<16x32xf32> to vector<16x8xf32>
    %cst_16 = arith.constant dense<0.000000e+00> : vector<16x16xf32>
    %30 = tpu.matmul %27, %28, %cst_16 {dimension_numbers = #tpu.dot_dimension_numbers<[1], [1], [0], [0], [0, 0, 1, 0], [], []>} : vector<16x8xf32>, vector<16x8xf32>, vector<16x16xf32> -> vector<16x16xf32>
    %cst_17 = arith.constant dense<0xFF800000> : vector<16xf32>
    %31 = vector.multi_reduction <maximumf>, %30, %cst_17 [1] : vector<16x16xf32> to vector<16xf32>
    %32 = vector.shape_cast %31 : vector<16xf32> to vector<16x1xf32>
    %33 = vector.broadcast %32 : vector<16x1xf32> to vector<16x16xf32>
    %34 = arith.subf %30, %33 : vector<16x16xf32>
    %35 = math.exp %34 : vector<16x16xf32>
    %cst_18 = arith.constant dense<0.000000e+00> : vector<16xf32>
    %36 = vector.multi_reduction <add>, %35, %cst_18 [1] : vector<16x16xf32> to vector<16xf32>
    %37 = vector.shape_cast %36 : vector<16xf32> to vector<16x1xf32>
    %38 = tpu.reciprocal %37 {approx = true} : vector<16x1xf32> -> vector<16x1xf32>
    %39 = vector.broadcast %38 : vector<16x1xf32> to vector<16x16xf32>
    %40 = arith.mulf %35, %39 : vector<16x16xf32>
    %cst_19 = arith.constant dense<0.000000e+00> : vector<16x8xf32>
    %41 = tpu.matmul %40, %29, %cst_19 {dimension_numbers = #tpu.dot_dimension_numbers<[1], [0], [0], [1], [0, 0, 1, 1], [], []>} : vector<16x16xf32>, vector<16x8xf32>, vector<16x8xf32> -> vector<16x8xf32>
    %c0_20 = arith.constant 0 : index
    %c8 = arith.constant 8 : index
    %42 = vector.load %arg13[%c0_20, %c8] : memref<16x32xf32, #tpu.memory_space<vmem>>, vector<16x8xf32>
    tpu.vector_store %arg13[%c0_20, %c8], %41 {strides = array<i32>} : memref<16x32xf32, #tpu.memory_space<vmem>>, vector<16x8xf32>,
    %43 = vector.extract_strided_slice %8 {offsets = [0, 16], sizes = [16, 8], strides = [1, 1]} : vector<16x32xf32> to vector<16x8xf32>
    %44 = vector.extract_strided_slice %9 {offsets = [0, 16], sizes = [16, 8], strides = [1, 1]} : vector<16x32xf32> to vector<16x8xf32>
    %45 = vector.extract_strided_slice %10 {offsets = [0, 16], sizes = [16, 8], strides = [1, 1]} : vector<16x32xf32> to vector<16x8xf32>
    %cst_21 = arith.constant dense<0.000000e+00> : vector<16x16xf32>
    %46 = tpu.matmul %43, %44, %cst_21 {dimension_numbers = #tpu.dot_dimension_numbers<[1], [1], [0], [0], [0, 0, 1, 0], [], []>} : vector<16x8xf32>, vector<16x8xf32>, vector<16x16xf32> -> vector<16x16xf32>
    %cst_22 = arith.constant dense<0xFF800000> : vector<16xf32>
    %47 = vector.multi_reduction <maximumf>, %46, %cst_22 [1] : vector<16x16xf32> to vector<16xf32>
    %48 = vector.shape_cast %47 : vector<16xf32> to vector<16x1xf32>
    %49 = vector.broadcast %48 : vector<16x1xf32> to vector<16x16xf32>
    %50 = arith.subf %46, %49 : vector<16x16xf32>
    %51 = math.exp %50 : vector<16x16xf32>
    %cst_23 = arith.constant dense<0.000000e+00> : vector<16xf32>
    %52 = vector.multi_reduction <add>, %51, %cst_23 [1] : vector<16x16xf32> to vector<16xf32>
    %53 = vector.shape_cast %52 : vector<16xf32> to vector<16x1xf32>
    %54 = tpu.reciprocal %53 {approx = true} : vector<16x1xf32> -> vector<16x1xf32>
    %55 = vector.broadcast %54 : vector<16x1xf32> to vector<16x16xf32>
    %56 = arith.mulf %51, %55 : vector<16x16xf32>
    %cst_24 = arith.constant dense<0.000000e+00> : vector<16x8xf32>
    %57 = tpu.matmul %56, %45, %cst_24 {dimension_numbers = #tpu.dot_dimension_numbers<[1], [0], [0], [1], [0, 0, 1, 1], [], []>} : vector<16x16xf32>, vector<16x8xf32>, vector<16x8xf32> -> vector<16x8xf32>
    %c0_25 = arith.constant 0 : index
    %c16 = arith.constant 16 : index
    %58 = vector.load %arg13[%c0_25, %c16] : memref<16x32xf32, #tpu.memory_space<vmem>>, vector<16x8xf32>
    tpu.vector_store %arg13[%c0_25, %c16], %57 {strides = array<i32>} : memref<16x32xf32, #tpu.memory_space<vmem>>, vector<16x8xf32>,
    %59 = vector.extract_strided_slice %8 {offsets = [0, 24], sizes = [16, 8], strides = [1, 1]} : vector<16x32xf32> to vector<16x8xf32>
    %60 = vector.extract_strided_slice %9 {offsets = [0, 24], sizes = [16, 8], strides = [1, 1]} : vector<16x32xf32> to vector<16x8xf32>
    %61 = vector.extract_strided_slice %10 {offsets = [0, 24], sizes = [16, 8], strides = [1, 1]} : vector<16x32xf32> to vector<16x8xf32>
    %cst_26 = arith.constant dense<0.000000e+00> : vector<16x16xf32>
    %62 = tpu.matmul %59, %60, %cst_26 {dimension_numbers = #tpu.dot_dimension_numbers<[1], [1], [0], [0], [0, 0, 1, 0], [], []>} : vector<16x8xf32>, vector<16x8xf32>, vector<16x16xf32> -> vector<16x16xf32>
    %cst_27 = arith.constant dense<0xFF800000> : vector<16xf32>
    %63 = vector.multi_reduction <maximumf>, %62, %cst_27 [1] : vector<16x16xf32> to vector<16xf32>
    %64 = vector.shape_cast %63 : vector<16xf32> to vector<16x1xf32>
    %65 = vector.broadcast %64 : vector<16x1xf32> to vector<16x16xf32>
    %66 = arith.subf %62, %65 : vector<16x16xf32>
    %67 = math.exp %66 : vector<16x16xf32>
    %cst_28 = arith.constant dense<0.000000e+00> : vector<16xf32>
    %68 = vector.multi_reduction <add>, %67, %cst_28 [1] : vector<16x16xf32> to vector<16xf32>
    %69 = vector.shape_cast %68 : vector<16xf32> to vector<16x1xf32>
    %70 = tpu.reciprocal %69 {approx = true} : vector<16x1xf32> -> vector<16x1xf32>
    %71 = vector.broadcast %70 : vector<16x1xf32> to vector<16x16xf32>
    %72 = arith.mulf %67, %71 : vector<16x16xf32>
    %cst_29 = arith.constant dense<0.000000e+00> : vector<16x8xf32>
    %73 = tpu.matmul %72, %61, %cst_29 {dimension_numbers = #tpu.dot_dimension_numbers<[1], [0], [0], [1], [0, 0, 1, 1], [], []>} : vector<16x16xf32>, vector<16x8xf32>, vector<16x8xf32> -> vector<16x8xf32>
    %c0_30 = arith.constant 0 : index
    %c24 = arith.constant 24 : index
    %74 = vector.load %arg13[%c0_30, %c24] : memref<16x32xf32, #tpu.memory_space<vmem>>, vector<16x8xf32>
    tpu.vector_store %arg13[%c0_30, %c24], %73 {strides = array<i32>} : memref<16x32xf32, #tpu.memory_space<vmem>>, vector<16x8xf32>,
    %c0_31 = arith.constant 0 : index
    %c0_32 = arith.constant 0 : index
    %75 = vector.load %arg13[%c0_31, %c0_32] : memref<16x32xf32, #tpu.memory_space<vmem>>, vector<16x32xf32>
    %c0_33 = arith.constant 0 : index
    %c0_34 = arith.constant 0 : index
    %76 = vector.load %arg8[%c0_33, %c0_34] : memref<32x32xf32, #tpu.memory_space<vmem>>, vector<32x32xf32>
    %cst_35 = arith.constant dense<0.000000e+00> : vector<16x32xf32>
    %77 = tpu.matmul %75, %76, %cst_35 {dimension_numbers = #tpu.dot_dimension_numbers<[1], [0], [0], [1], [0, 0, 1, 1], [], []>} : vector<16x32xf32>, vector<32x32xf32>, vector<16x32xf32> -> vector<16x32xf32>
    %c0_36 = arith.constant 0 : index
    %c0_37 = arith.constant 0 : index
    %78 = vector.load %arg9[%c0_36, %c0_37] : memref<1x32xf32, #tpu.memory_space<vmem>>, vector<1x32xf32>
    %79 = vector.broadcast %78 : vector<1x32xf32> to vector<16x32xf32>
    %80 = arith.addf %77, %79 : vector<16x32xf32>
    %c0_38 = arith.constant 0 : index
    %c0_39 = arith.constant 0 : index
    %c0_40 = arith.constant 0 : index
    %81 = vector.load %arg10[%c0_38, %c0_39, %c0_40] : memref<1x16x32xf32, #tpu.memory_space<vmem>>, vector<1x16x32xf32>
    %82 = vector.shape_cast %81 : vector<1x16x32xf32> to vector<16x32xf32>
    %83 = vector.shape_cast %80 : vector<16x32xf32> to vector<1x16x32xf32>
    tpu.vector_store %arg10[%c0_38, %c0_39, %c0_40], %83 {strides = array<i32>} : memref<1x16x32xf32, #tpu.memory_space<vmem>>, vector<1x16x32xf32>,
    return
  }
  func.func @transform_0(%arg0: i32, %arg1: i32) -> (i32, i32, i32) {
    %c0_i32 = arith.constant 0 : i32
    %c0_i32_0 = arith.constant 0 : i32
    return %arg0, %arg1, %c0_i32 : i32, i32, i32
  }
  func.func @transform_1(%arg0: i32, %arg1: i32) -> (i32, i32, i32) {
    %c0_i32 = arith.constant 0 : i32
    %c0_i32_0 = arith.constant 0 : i32
    %c0_i32_1 = arith.constant 0 : i32
    return %arg0, %c0_i32, %c0_i32_0 : i32, i32, i32
  }
  func.func @transform_2(%arg0: i32, %arg1: i32) -> (i32, i32, i32) {
    %c0_i32 = arith.constant 0 : i32
    %c0_i32_0 = arith.constant 0 : i32
    %c0_i32_1 = arith.constant 0 : i32
    return %arg0, %c0_i32, %c0_i32_0 : i32, i32, i32
  }
  func.func @transform_3(%arg0: i32, %arg1: i32) -> (i32, i32) {
    %c0_i32 = arith.constant 0 : i32
    %c0_i32_0 = arith.constant 0 : i32
    %c0_i32_1 = arith.constant 0 : i32
    return %c0_i32, %c0_i32_0 : i32, i32
  }
  func.func @transform_4(%arg0: i32, %arg1: i32) -> (i32, i32) {
    %c0_i32 = arith.constant 0 : i32
    %c0_i32_0 = arith.constant 0 : i32
    %c0_i32_1 = arith.constant 0 : i32
    return %c0_i32, %c0_i32_0 : i32, i32
  }
  func.func @transform_5(%arg0: i32, %arg1: i32) -> (i32, i32) {
    %c0_i32 = arith.constant 0 : i32
    %c0_i32_0 = arith.constant 0 : i32
    %c0_i32_1 = arith.constant 0 : i32
    return %c0_i32, %c0_i32_0 : i32, i32
  }
  func.func @transform_6(%arg0: i32, %arg1: i32) -> (i32, i32) {
    %c0_i32 = arith.constant 0 : i32
    %c0_i32_0 = arith.constant 0 : i32
    %c0_i32_1 = arith.constant 0 : i32
    return %c0_i32, %c0_i32_0 : i32, i32
  }
  func.func @transform_7(%arg0: i32, %arg1: i32) -> (i32, i32) {
    %c0_i32 = arith.constant 0 : i32
    %c0_i32_0 = arith.constant 0 : i32
    %c0_i32_1 = arith.constant 0 : i32
    return %c0_i32, %c0_i32_0 : i32, i32
  }
  func.func @transform_8(%arg0: i32, %arg1: i32) -> (i32, i32, i32) {
    %c0_i32 = arith.constant 0 : i32
    %c0_i32_0 = arith.constant 0 : i32
    return %arg0, %arg1, %c0_i32 : i32, i32, i32
  }
}

</mosaic_0001>

<bundles_post_ra>
// kernel: tpu_custom_call.1
= control target key start
LH: loop header
LB: loop body
LE: loop exit
PB: predicated region body
PF: predicated region fallthrough
CT: control target
= control target key end

     0   :  { %s2979_s0 = inlined_call_operand.hbm [shape: f32[2,16,32], index: 0, kind: input, shape index: {}]   ;;  %s2980_s1 = inlined_call_operand.hbm [shape: f32[2,16,32], index: 1, kind: input, shape index: {}]   ;;  %s2981_s2 = inlined_call_operand.hbm [shape: f32[2,16,32], index: 2, kind: input, shape index: {}]   ;;  %s2982_s3 = inlined_call_operand.hbm [shape: f32[32,32], index: 3, kind: input, shape index: {}]   ;;  %s2983_s4 = inlined_call_operand.hbm [shape: f32[32,32], index: 4, kind: input, shape index: {}]   ;;  %s2984_s5 = inlined_call_operand.hbm [shape: f32[32,32], index: 5, kind: input, shape index: {}]   ;;  %s2985_s6 = inlined_call_operand.hbm [shape: f32[32,32], index: 6, kind: input, shape index: {}]   ;;  %s2986_s7 = inlined_call_operand.vmem [shape: f32[1,32], index: 7, kind: input, shape index: {}]   ;;  %s2987_s8 = inlined_call_operand.hbm [shape: f32[2,16,32], index: 8, kind: output, shape index: {}]  }
   0x1   :  { %3002 = sst [smem:[#allocation25_spill]] %s2980_s1 }
   0x2   :  { %3003 = sst [smem:[#allocation26_spill]] %s2982_s3 }
   0x3   :  { %13 = vsyncpa [#allocation6], 0 }
   0x4   :  { %15 = vsyncpa [#allocation6 + $0x1], 0 }
   0x5   :  { %16 = vsyncpa [#allocation9], 0 }
   0x6   :  { %17 = vsyncpa [#allocation12], 0 }
   0x7   :  { %18 = vsyncpa [#allocation15], 0 }
   0x8   :  { %19 = vsyncpa [#allocation7], 0 }
   0x9   :  { %21 = vsyncpa [#allocation7 + $0x1], 0  ;;  %s2533_s27 = smov 0   ;;  %s2535_s28 = smov 0  }
   0xa   :  { %s2537_s29 = smov 0   ;;  %s2539_s30 = smov 0  }
   0xb   :  { %s2541_s9 = smov 0   ;;  %s2543_s10 = smov 0  }
   0xc LB: > { %3004 = sst [smem:[#allocation23_spill]] %s2449_s27  ;;  %s1813_s11 = sadd.s32 4294967295, %s2469_s10   ;;  %s2469_s10 = sphi %s2543_s10, %s27_s10   ;;  %s2465_s9 = sphi %s2541_s9, %s3037_s9   ;;  %s2461_s30 = sphi %s2539_s30, %s3036_s30   ;;  %s2457_s29 = sphi %s2537_s29, %s3035_s29   ;;  %s2453_s28 = sphi %s2535_s28, %s3034_s28   ;;  %s2449_s27 = sphi %s2533_s27, %s3033_s27  }
   0xd   : > { %s1814_s12 = sadd.s32 4294967294, %s2469_s10   ;;  %p61_p0 = scmp.ne.s32.totalorder %s2453_s28, %s2449_s27 }
   0xe   : > { %p2565_p1 = scmp.eq.s32.totalorder %s1813_s11, 0  ;;  %p2569_p2 = scmp.eq.s32.totalorder %s1813_s11, 1 }
   0xf   : > { %p250_p3 = scmp.eq.s32.totalorder %s1814_s12, 1  ;;  %p1815_p5 = scmp.ge.s32.totalorder %s2469_s10, 1 }
  0x10   : > { %s3005_s13 = scalar_select %p2565_p1, 1, 0 }
  0x11   : > { %s3006_s14 = scalar_select %p2569_p2, 1, 0 }
  0x12   : > { %p2575_p4 = por %p2565_p1, %p61_p0  ;;  %p2580_p6 = por %p250_p3, %p61_p0 }
  0x13   : > { %p257_p7 = scmp.lt.s32.totalorder %s2469_s10, 3  ;;  %s2585_s17 = sshll.u32 %s2461_s30, 8 }
  0x14   : > { %s3007_s15 = scalar_select %p2575_p4, 1, 0 }
  0x15   : > { %s3008_s16 = scalar_select %p2580_p6, 1, 0 }
  0x16   : > { %p2587_p8 = pnand %p1815_p5, %p257_p7  ;;  %s3011_s1 = sld [smem:[#allocation25_spill]] }
  0x17   : > { %3009 = sst [smem:[#allocation24_spill]] %s3008_s16  ;;  %s2471_s22 = smov [#allocation8]  }
  0x18   : > { %s3010_s18 = scalar_select %p2587_p8, 1, 0 }
  0x19   : > { %s272_s23 = sshll.u32 %s2471_s22, 4  ;;  %p2989_p9 = pneg %p2587_p8  ;;  %s2599_s23 = int_to_ptr.vmem [resolvable:$true] %s272_s23 }
  0x1a   : > { %s2605_s26 = scalar_lea.hbm %s2981_s2, %s2585_s17  ;;  %s2472_s11 = smov [#allocation11]  }
  0x1b   : > { %p2612_p10 = pnand %p2989_p9, %p2575_p4  ;;  %s301_s12 = sshll.u32 %s2472_s11, 4  ;;  %s302_s12 = int_to_ptr.vmem [resolvable:$true] %s301_s12 }
  0x1c   : > { %s2595_s21 = scalar_lea.hbm %s3011_s1, %s2585_s17  ;;  %s2194_s24 = scalar_lea.hbm %s3011_s1, 512 }
  0x1d   : > { %s2189_s19 = scalar_lea.hbm %s2595_s21, 256  ;;  %p2191_p13 = pneg %p2612_p10 }
  0x1e   : > { %p2190_p12 = scmp.ne.s32.totalorder %s2595_s21, %s2189_s19  ;;  %p2195_p5 = scmp.lt.s32.totalorder %s2595_s21, %s3011_s1 }
  0x1f   : > { %p2196_p7 = scmp.lt.s32.totalorder %s2194_s24, %s2189_s19 }
  0x20   : > { %p2192_p0 = pnand %p2191_p13, %p2190_p12 }
  0x21   : > { %p2197_p11 = por %p2196_p7, %p2195_p5 }
  0x22   : > { %p2193_p3 = pneg %p2192_p0 }
  0x24   : > { %p2198_p9 = pnand %p2197_p11, %p2193_p3 }
  0x26   : > { %2201 = shalt.err (!%p2198_p9)
}
  0x27   : > { %s2202_s11 = scalar_lea.vmem %s2599_s23, 256  ;;  %p2210_p4 = scmp.lt.s32.totalorder %s2599_s23, %s2599_s23 }
  0x28   : > { %p2203_p6 = scmp.ne.s32.totalorder %s2599_s23, %s2202_s11  ;;  %p2211_p2 = scmp.lt.s32.totalorder %s2202_s11, %s2202_s11 }
  0x2a   : > { %p2205_p12 = pnand %p2203_p6, %p2191_p13  ;;  %p2212_p8 = por %p2211_p2, %p2210_p4 }
  0x2c   : > { %p2206_p0 = pneg %p2205_p12 }
  0x2e   : > { %p2213_p1 = pnand %p2212_p8, %p2206_p0 }
  0x30   : > { %2216 = shalt.err (!%p2213_p1)
}
  0x31   : > { %s3000_s16 = smov 128   ;;  %s3001_s19 = smov 8  }
  0x32   : > { %2060 = dma.hbm_to_vmem [thread:$0]  (!%p2612_p10), %s2595_s21, 256, %s2599_s23, [#allocation9], %s3000_s16, %s3000_s16, %s3001_s19  }
  0x33   : > { %p3013_p6 = scmp.ne.s32.totalorder %s3005_s13, 0  ;;  %p3014_p9 = scmp.ne.s32.totalorder %s3010_s18, 0 }
  0x34   : > { %s2475_s22 = smov [#allocation14]   ;;  %s2228_s25 = scalar_lea.vmem %s302_s12, 512 }
  0x35   : > { %p3015_p11 = pneg %p3014_p9  ;;  %s327_s24 = sshll.u32 %s2475_s22, 4  ;;  %s328_s24 = int_to_ptr.vmem [resolvable:$true] %s327_s24 }
  0x36   : > { %p2229_p2 = scmp.ne.s32.totalorder %s302_s12, %s2228_s25  ;;  %p2236_p5 = scmp.lt.s32.totalorder %s302_s12, %s302_s12 }
  0x37   : > { %p2650_p3 = pnand %p3015_p11, %p3013_p6  ;;  %p2237_p7 = scmp.lt.s32.totalorder %s2228_s25, %s2228_s25 }
  0x39   : > { %s3016_s20 = scalar_select %p2650_p3, 1, 0 }
  0x3a   : > { %p2997_p1 = pneg %p2650_p3  ;;  %p2238_p12 = por %p2237_p7, %p2236_p5 }
  0x3c   : > { %p2231_p4 = pnand %p2229_p2, %p2997_p1 }
  0x3e   : > { %p2232_p8 = pneg %p2231_p4 }
  0x40   : > { %p2239_p0 = pnand %p2238_p12, %p2232_p8 }
  0x42   : > { %2242 = shalt.err (!%p2239_p0)
}
  0x43   : > { %s3017_s3 = sld [smem:[#allocation26_spill]]  ;;  %s2476_s11 = smov [#allocation10]  }
  0x44   : > { %s288_s22 = sshll.u32 %s2476_s11, 4  ;;  %s2254_s1 = scalar_lea.vmem %s328_s24, 512  ;;  %s289_s22 = int_to_ptr.vmem [resolvable:$true] %s288_s22 }
  0x45   : > { %p2255_p6 = scmp.ne.s32.totalorder %s328_s24, %s2254_s1  ;;  %p2262_p4 = scmp.lt.s32.totalorder %s328_s24, %s328_s24 }
  0x46   : > { %p2263_p8 = scmp.lt.s32.totalorder %s2254_s1, %s2254_s1 }
  0x47   : > { %p2257_p11 = pnand %p2255_p6, %p2997_p1 }
  0x48   : > { %p2264_p5 = por %p2263_p8, %p2262_p4 }
  0x49   : > { %2066 = dma.hbm_to_vmem [thread:$0]  (!%p2650_p3), %s3017_s3, 512, %s302_s12, [#allocation12], %s3000_s16, %s3000_s16, %s3001_s19  }
  0x4a   : > { %p2258_p2 = pneg %p2257_p11 }
  0x4c   : > { %p2265_p7 = pnand %p2264_p5, %p2258_p2 }
  0x4e   : > { %2268 = shalt.err (!%p2265_p7)
}
  0x4f   : > { %2072 = dma.hbm_to_vmem [thread:$0]  (!%p2650_p3), %s2984_s5, 512, %s328_s24, [#allocation15], %s3000_s16, %s3000_s16, %s3001_s19  }
  0x50   : > { %s2269_s21 = scalar_lea.hbm %s2605_s26, 256  ;;  %s2274_s11 = scalar_lea.hbm %s2981_s2, 512 }
  0x51   : > { %p2270_p12 = scmp.ne.s32.totalorder %s2605_s26, %s2269_s21  ;;  %p2275_p11 = scmp.lt.s32.totalorder %s2605_s26, %s2981_s2 }
  0x52   : > { %p2276_p2 = scmp.lt.s32.totalorder %s2274_s11, %s2269_s21 }
  0x53   : > { %p2272_p0 = pnand %p2270_p12, %p2191_p13 }
  0x54   : > { %p2277_p4 = por %p2276_p2, %p2275_p11 }
  0x55   : > { %p2273_p6 = pneg %p2272_p0 }
  0x57   : > { %p2278_p8 = pnand %p2277_p4, %p2273_p6 }
  0x59   : > { %2281 = shalt.err (!%p2278_p8)
}
  0x5a   : > { %s2282_s24 = scalar_lea.vmem %s289_s22, 256  ;;  %p2290_p0 = scmp.lt.s32.totalorder %s289_s22, %s289_s22 }
  0x5b   : > { %p2283_p5 = scmp.ne.s32.totalorder %s289_s22, %s2282_s24  ;;  %p2291_p1 = scmp.lt.s32.totalorder %s2282_s24, %s2282_s24 }
  0x5d   : > { %p2285_p7 = pnand %p2283_p5, %p2191_p13  ;;  %p2292_p9 = por %p2291_p1, %p2290_p0 }
  0x5f   : > { %p2286_p12 = pneg %p2285_p7 }
  0x61   : > { %p2293_p3 = pnand %p2292_p9, %p2286_p12 }
  0x63   : > { %2296 = shalt.err (!%p2293_p3)
}
  0x64   : > { %2063 = dma.hbm_to_vmem [thread:$0]  (!%p2612_p10), %s2605_s26, 256, %s289_s22, [#allocation9], %s3000_s16, %s3000_s16, %s3001_s19  }
  0x65   : > { %s2477_s3 = smov [#allocation13]   ;;  %s2478_s12 = smov [#allocation16]  }
  0x66   : > { %s314_s27 = sshll.u32 %s2477_s3, 4  ;;  %s340_s25 = sshll.u32 %s2478_s12, 4  ;;  %s315_s27 = int_to_ptr.vmem [resolvable:$true] %s314_s27  ;;  %s341_s25 = int_to_ptr.vmem [resolvable:$true] %s340_s25 }
  0x67   : > { %s2308_s21 = scalar_lea.vmem %s315_s27, 512  ;;  %p3018_p6 = scmp.ne.s32.totalorder %s3016_s20, 0 }
  0x68   : > { %p2309_p13 = scmp.ne.s32.totalorder %s315_s27, %s2308_s21  ;;  %p2316_p3 = scmp.lt.s32.totalorder %s315_s27, %s315_s27 }
  0x69   : > { %p3019_p11 = pneg %p3018_p6  ;;  %p2317_p2 = scmp.lt.s32.totalorder %s2308_s21, %s2308_s21 }
  0x6b   : > { %p2311_p1 = pnand %p2309_p13, %p3019_p11  ;;  %p2318_p4 = por %p2317_p2, %p2316_p3 }
  0x6d   : > { %p2312_p9 = pneg %p2311_p1 }
  0x6f   : > { %p2319_p8 = pnand %p2318_p4, %p2312_p9 }
  0x71   : > { %2322 = shalt.err (!%p2319_p8)
}
  0x72   : > { %2069 = dma.hbm_to_vmem [thread:$0]  (!%p3018_p6), %s2983_s4, 512, %s315_s27, [#allocation12], %s3000_s16, %s3000_s16, %s3001_s19  }
  0x73   : > { %s2334_s22 = scalar_lea.vmem %s341_s25, 512  ;;  %p3020_p5 = pmov %p3019_p11 }
  0x74   : > { %p2335_p10 = scmp.ne.s32.totalorder %s341_s25, %s2334_s22  ;;  %p2342_p0 = scmp.lt.s32.totalorder %s341_s25, %s341_s25 }
  0x75   : > { %p2343_p13 = scmp.lt.s32.totalorder %s2334_s22, %s2334_s22 }
  0x76   : > { %p2337_p7 = pnand %p2335_p10, %p3020_p5 }
  0x77   : > { %p2344_p11 = por %p2343_p13, %p2342_p0 }
  0x78   : > { %p2338_p12 = pneg %p2337_p7 }
  0x7a   : > { %p2345_p1 = pnand %p2344_p11, %p2338_p12 }
  0x7c   : > { %2348 = shalt.err (!%p2345_p1)
}
  0x7d   : > { %2075 = dma.hbm_to_vmem [thread:$0]  (!%p3018_p6), %s2985_s6, 512, %s341_s25, [#allocation15], %s3000_s16, %s3000_s16, %s3001_s19  }
  0x7e   : > { %s48_s11 = sadd.s32 1, %s2457_s29  ;;  %s39_s20 = sadd.s32 1, %s2465_s9 }
  0x7f   : > { %p55_p9 = scmp.ne.s32.totalorder %s2457_s29, %s2453_s28  ;;  %p41_p3 = scmp.ge.s32.totalorder %s39_s20, 2 }
  0x80   : > { %p56_p2 = scmp.eq.s32.totalorder %s2469_s10, 0  ;;  %p3021_p4 = scmp.ne.s32.totalorder %s3006_s14, 0 }
  0x81   : > { %p2088_p10 = scmp.lt.s32.totalorder %s2469_s10, 2  ;;  %s3039_s20 = smov (%p41_p3, %s39_s20), 0 }
  0x82   : > { %p2728_p8 = por %p3021_p4, %p55_p9  ;;  %p57_p5 = por %p56_p2, %p55_p9 }
  0x83   : > { %s357_s3 = sand.u32 1, %s2457_s29   ;;  %s43_s27 = ssub.s32 %s2465_s9, %s3039_s20 }
  0x84   : > { %p46_p7 = scmp.eq.s32.totalorder %s43_s27, 0  ;;  %s1825_s12 = sshll.u32 %s357_s3, 4 }
  0x85   : > { %s1875_s25 = sshll.u32 %s2465_s9, 8  ;;  %s361_s22 = scalar_lea.vmem [#allocation5], %s1825_s12 }
  0x86   : > { %s2740_s21 = scalar_select %p46_p7, %s2457_s29, %s48_s11  }
  0x87   : > { %s369_s14 = scalar_lea.hbm %s2979_s0, %s1875_s25  ;;  %s370_s1 = sshll.u32 %s361_s22, 4  ;;  %s371_s1 = int_to_ptr.vmem [resolvable:$true] %s370_s1 }
  0x88   : > { %p2747_p6 = pnand %p2088_p10, %p57_p5  ;;  %s358_s16 = scalar_lea.sflag [#allocation6], %s357_s3 }
  0x89   : > { %s2362_s27 = scalar_lea.vmem %s371_s1, 256  ;;  %s2479_s11 = smov [#allocation5]  }
  0x8a   : > { %p2351_p12 = pneg %p2747_p6  ;;  %p2363_p0 = scmp.ne.s32.totalorder %s371_s1, %s2362_s27 }
  0x8b   : > { %s2367_s19 = sshll.u32 %s2479_s11, 4  ;;  %s2368_s19 = int_to_ptr.vmem [resolvable:$false] %s2367_s19 }
  0x8c   : > { %p2365_p13 = pnand %p2363_p0, %p2351_p12  ;;  %s2369_s25 = scalar_lea.vmem %s2368_s19, 512 }
  0x8d   : > { %p2370_p1 = scmp.lt.s32.totalorder %s371_s1, %s2368_s19  ;;  %p2371_p9 = scmp.lt.s32.totalorder %s2369_s25, %s2362_s27 }
  0x8e   : > { %p2366_p11 = pneg %p2365_p13 }
  0x8f   : > { %p2372_p3 = por %p2371_p9, %p2370_p1 }
  0x91   : > { %p2373_p2 = pnand %p2372_p3, %p2366_p11 }
  0x93   : > { %2376 = shalt.err (!%p2373_p2)
}
  0x94   : > { %s3024_s12 = smov 8   ;;  %s3025_s26 = smov 128  }
  0x95   : > { %2079 = dma.hbm_to_vmem [thread:$0]  (!%p2747_p6), %s369_s14, 256, %s371_s1, %s358_s16, %s3025_s26, %s3025_s26, %s3024_s12  }
  0x96   : > { %p3026_p4 = scmp.ne.s32.totalorder %s3010_s18, 0 }
  0x97   : > { %s2761_s3 = sand.u32 (!%p3026_p4), 1, %s2453_s28   ;;  %p3027_p10 = scmp.ne.s32.totalorder (!%p3026_p4), %s3007_s15, 0 }
  0x98   : > { %382 = sbr.rel (%p3026_p4) target bundleno = 2983 (0xba7), region = 52  ;;  %s1829_s19 = sshll.u32 (!%p3026_p4), %s2761_s3, 4 }
  0x99   : > { %s385_s30 = scalar_lea.sflag (!%p3026_p4), [#allocation6], %s2761_s3  ;;  %s2767_s22 = scalar_lea.vmem (!%p3026_p4), [#allocation5], %s1829_s19 }
  0x9d   : > { %2428 = dma.done.wait (%p3027_p10), %s385_s30, 256  }
  0x9e   : > { %2430 = vsyncadd (%p3027_p10), %s385_s30, 4294967040 }
  0x9f   : > { %2432 = dma.done.wait (%p3027_p10), [#allocation9], 512  }
  0xa0   : > { %2434 = vsyncadd (%p3027_p10), [#allocation9], 4294966784  ;;  %p3028_p5 = scmp.ne.s32.totalorder %s3005_s13, 0 }
  0xa2   : > { %2436 = dma.done.wait (%p3028_p5), [#allocation12], 1024  }
  0xa3   : > { %2438 = vsyncadd (%p3028_p5), [#allocation12], 4294966272 }
  0xa4   : > { %2440 = dma.done.wait (%p3028_p5), [#allocation15], 1024  }
  0xa5   : > { %2442 = vsyncadd (%p3028_p5), [#allocation15], 4294966272  ;;  %vm459_vm0 = vcmask 261120   ;;  %v458_v0 = vld [vmem:[#allocation13 + $0x18] sm:$0xff]  ;;  %v457_v1 = vld [vmem:[#allocation13 + $0x10] sm:$0xff]  ;;  %vm724_vm1 = vcmask 64512   ;;  %s2929_s30 = scalar_lea.hbm %s2987_s8, %s2585_s17 }
  0xa6   : > { %1933 = vmatprep.subr.mxu0 %v458_v0  ;;  %v451_v2 = vld [vmem:[#allocation8] sm:$0xff]  ;;  %v456_v3 = vld [vmem:[#allocation13 + $0x8] sm:$0xff]  ;;  %v546_v5 = vld [vmem:[#allocation14 + $0x18] sm:$0xff]  ;;  %s2480_s13 = smov 120   ;;  %vm812_vm2 = vcmask 130048   ;;  %s2481_s15 = smov 112  }
  0xa7   : > { %1934 = vmatpush3.msra.mxu0 %v458_v0  ;;  %1941 = vmatprep.mubr.msk.f32.mxu0 %vm459_vm0, %v451_v2  ;;  %v455_v4 = vld [vmem:[#allocation13] sm:$0xff]  ;;  %v452_v6 = vld [vmem:[#allocation8 + $0x8] sm:$0xff]  ;;  %v635_v7 = vld [vmem:[#allocation11 + $0x18] sm:$0xff]  ;;  %s2482_s18 = smov 104   ;;  %s2483_s16 = smov 8   ;;  %vm1128_vm3 = vcmask 130112  }
  0xa8   : > { %1935 = vmatprep.subr.mxu0 %v457_v1  ;;  %1944 = vmatprep.subr.mxu1 %v546_v5  ;;  %v630_v8 = vld [vmem:[%s2767_s22] sm:$0xff]  ;;  %v633_v10 = vld [vmem:[#allocation11 + $0x8] sm:$0xff]  ;;  %v454_v17 = vld [vmem:[#allocation10 + $0x8] sm:$0xff]  ;;  %s2484_s14 = smov 16   ;;  %vm1339_vm4 = vcmask 195712   ;;  %s2485_s1 = smov 24  }
  0xa9   : > { %1936 = vmatpush3.msra.mxu0 %v457_v1  ;;  %1945 = vmatpush3.msra.mxu1 %v546_v5  ;;  %v634_v9 = vld [vmem:[#allocation11 + $0x10] sm:$0xff]  ;;  %v632_v11 = vld [vmem:[#allocation11] sm:$0xff]  ;;  %v631_v12 = vld [vmem:[%s2767_s22 + $0x8] sm:$0xff]  ;;  %vm1550_vm5 = vcmask 261312   ;;  %s444_s11 = scalar_lea.vmem [#allocation17], %s1829_s19  ;;  %s1650_s19 = scalar_lea.sflag [#allocation7], %s2761_s3 }
  0xaa   : > { %1937 = vmatprep.subr.mxu0 %v456_v3  ;;  %v545_v13 = vld [vmem:[#allocation14 + $0x10] sm:$0xff]  ;;  %v544_v14 = vld [vmem:[#allocation14 + $0x8] sm:$0xff]  ;;  %v543_v15 = vld [vmem:[#allocation14] sm:$0xff]  ;;  %s1665_s25 = sshll.u32 %s444_s11, 4  ;;  %s2922_s25 = int_to_ptr.vmem [resolvable:$true] %s1665_s25 }
  0xab   : > { %1938 = vmatpush3.msra.mxu0 %v456_v3  ;;  %1946 = vmatprep.subr.mxu1 %v545_v13  ;;  %v453_v16 = vld [vmem:[#allocation10] sm:$0xff]  ;;  %s2377_s22 = scalar_lea.vmem %s2922_s25, 256 }
  0xac   : > { %1939 = vmatprep.subr.mxu0 %v455_v4  ;;  %1947 = vmatpush3.msra.mxu1 %v545_v13  ;;  %p2378_p7 = scmp.ne.s32.totalorder %s2922_s25, %s2377_s22 }
  0xad   : > { %1940 = vmatpush3.msra.mxu0 %v455_v4  ;;  %1948 = vmatprep.subr.mxu1 %v544_v14 }
  0xae   : > { %1942 = vmatmul.mubr.msk.f32.vlgmr.msra.gmra.mxu0 %vm459_vm0, %v452_v6  ;;  %1955 = vmatprep.subr.mxu0 %v635_v7  ;;  %p2379_p6 = pnand %p2378_p7, %p2728_p8 }
  0xaf   : > { %1956 = vmatpush3.msra.mxu0 %v635_v7  ;;  %1963 = vmatprep.mubr.msk.f32.mxu0 %vm459_vm0, %v630_v8 }
  0xb0   : > { %1957 = vmatprep.subr.mxu0 %v634_v9  ;;  %1949 = vmatpush3.msra.mxu1 %v544_v14  ;;  %p2380_p12 = pneg %p2379_p6 }
  0xb1   : > { %1958 = vmatpush3.msra.mxu0 %v634_v9  ;;  %1952 = vmatprep.mubr.msk.f32.mxu1 %vm459_vm0, %v453_v16 }
  0xb2   : > { %1959 = vmatprep.subr.mxu0 %v633_v10  ;;  %1950 = vmatprep.subr.mxu1 %v543_v15 }
  0xb3   : > { %1960 = vmatpush3.msra.mxu0 %v633_v10  ;;  %1951 = vmatpush3.msra.mxu1 %v543_v15 }
  0xb4   : > { %1961 = vmatprep.subr.mxu0 %v632_v11  ;;  %1953 = vmatmul.mubr.msk.f32.vlgmr.msra.gmra.mxu1 %vm459_vm0, %v454_v17 }
  0xb5   : > { %1962 = vmatpush3.msra.mxu0 %v632_v11 }
  0xb6   : > { %1964 = vmatmul.mubr.msk.f32.vlgmr.msra.gmra.mxu0 %vm459_vm0, %v631_v12 }
 0x16e   : > { %v1943_v18 = vpop.f32.mrf.mxu0 }
 0x16f   : > { %542 = vst.msk [vmem:[#allocation2 + $0x8] sm:$0xff] %vm459_vm0, %v1943_v18 }
 0x170   : > { %v532_v19 = vpop.f32.mrf.mxu0 }
 0x171   : > { %541 = vst.msk [vmem:[#allocation2] sm:$0xff] %vm459_vm0, %v532_v19 }
 0x174   : > { %v1954_v26 = vpop.f32.mrf.mxu1 }
 0x175   : > { %629 = vst.msk [vmem:[#allocation3 + $0x8] sm:$0xff] %vm459_vm0, %v1954_v26 }
 0x176   : > { %v1965_v20 = vpop.f32.mrf.mxu0  ;;  %v2795_v21 = vld [vmem:[#allocation2 + $0x8] sm:$0xff]  ;;  %v619_v27 = vpop.f32.mrf.mxu1 }
 0x177   : > { %1966 = vmatprep.subr.msk.mxu1 %vm724_vm1, %v2795_v21  ;;  %v2813_v25 = vmul.f32 0.35355338, %v1965_v20  ;;  %628 = vst.msk [vmem:[#allocation3] sm:$0xff] %vm459_vm0, %v619_v27 }
 0x178   : > { %1967 = vmatpush3.xpose.msk.msra.mxu1 %vm724_vm1, %v2795_v21  ;;  %v709_v22 = vpop.f32.mrf.mxu0  ;;  %v2801_v23 = vld [vmem:[#allocation2] sm:$0xff] }
 0x179   : > { %v2803_v24 = vmul.f32 0.35355338, %v709_v22  ;;  %922 = vrot.lane.b32.xlu1 %v2801_v23, %s2480_s13  ;;  %1968 = vmatprep.subr.msk.mxu1 %vm724_vm1, %v2801_v23 }
 0x17b   : > { %1970 = vmatprep.mubr.msk.f32.mxu1 %vm724_vm1, %v2803_v24 }
 0x17c   : > { %1969 = vmatpush3.xpose.msk.msra.mxu1 %vm724_vm1, %v2801_v23  ;;  %v2821_v28 = vld [vmem:[#allocation3 + $0x8] sm:$0xff] }
 0x17d   : > { %918 = vrot.lane.b32.xlu1 %v2803_v24, %s2480_s13  ;;  %1973 = vmatprep.subr.mxu1 %v2821_v28 }
 0x17e   : > { %v2825_v29 = vld [vmem:[#allocation3] sm:$0xff] }
 0x17f   : > { %1971 = vmatmul.mubr.msk.f32.vlgmr.msra.gmra.mxu1 %vm724_vm1, %v2813_v25 }
 0x180   : > { %1974 = vmatpush3.msra.mxu1 %v2821_v28 }
 0x181   : > { %1975 = vmatprep.subr.mxu1 %v2825_v29 }
 0x182   : > { %1976 = vmatpush3.msra.mxu1 %v2825_v29 }
 0x1eb   : > { %v923_v45 = vpop.permute.xlu1 %922 }
 0x1ef   : > { %v919_v46 = vpop.permute.xlu1 %918 }
 0x23f   : > { %v1972_v30 = vpop.f32.mrf.mxu1 }
 0x240   : > { %v816_v33 = vsel %vm812_vm2, %v1972_v30, -inf }
 0x241   : > { %v803_v31 = vpop.f32.mrf.mxu1 }
 0x242   : > { %v813_v32 = vsel %vm812_vm2, %v803_v31, -inf }
 0x243   : > { %814 = vmax.xlane.f32.xlu0 %v813_v32 }
 0x247   : > { %817 = vmax.xlane.f32.xlu0 %v816_v33 }
 0x25d   : > { %924 = vrot.lane.b32.xlu0 %v2795_v21, %s2480_s13 }
 0x2cc   : > { %v815_v34 = vpop.xlane.xlu0 %814 }
 0x2cd   : > { %v819_v35 = vsub.f32 %v803_v31, %v815_v34 }
 0x2cf   : > { %v821_v38 = vmul.f32 1.442695, %v819_v35 }
 0x2d0   : > { %v818_v36 = vpop.xlane.xlu0 %817 }
 0x2d1   : > { %v820_v37 = vsub.f32 %v1972_v30, %v818_v36 }
 0x2d3   : > { %v823_v39 = vmul.f32 1.442695, %v820_v37 }
 0x2d4   : > { %v925_v40 = vpop.permute.xlu0 %924 }
 0x2d5   : > { %2157 = vpow2.f32 %v823_v39  ;;  %1980 = vmatprep.subr.msk.mxu1 %vm724_vm1, %v925_v40 }
 0x2d6   : > { %2159 = vpow2.f32 %v821_v38 }
 0x2e2   : > { %v2158_v41 = vpop.eup %2157 }
 0x2e3   : > { %v828_v42 = vsel %vm812_vm2, %v2158_v41, 0.0  ;;  %v2160_v43 = vpop.eup %2159 }
 0x2e4   : > { %829 = vadd.xlane.f32.xlu1 %v828_v42  ;;  %v825_v44 = vsel %vm812_vm2, %v2160_v43, 0.0 }
 0x2e8   : > { %826 = vadd.xlane.f32.xlu1 %v825_v44 }
 0x2f9   : > { %920 = vrot.lane.b32.xlu1 %v2813_v25, %s2480_s13 }
 0x36d   : > { %v830_v47 = vpop.xlane.xlu1 %829 }
 0x36e   : > { %2161 = vrcp.f32 %v830_v47 }
 0x371   : > { %v827_v48 = vpop.xlane.xlu1 %826 }
 0x372   : > { %2163 = vrcp.f32 %v827_v48 }
 0x375   : > { %v921_v53 = vpop.permute.xlu1 %920 }
 0x37b   : > { %v2162_v49 = vpop.eup %2161 }
 0x37c   : > { %v834_v52 = vmul.f32 %v2162_v49, %v2158_v41 }
 0x37f   : > { %v2164_v50 = vpop.eup %2163 }
 0x380   : > { %v833_v51 = vmul.f32 %v2164_v50, %v2160_v43 }
 0x382   : > { %1977 = vmatprep.mubr.msk.f32.mxu1 %vm812_vm2, %v833_v51 }
 0x383   : > { %1978 = vmatmul.mubr.msk.f32.vlgmr.msra.gmra.mxu1 %vm812_vm2, %v834_v52 }
 0x384   : > { %1981 = vmatpush3.xpose.msk.msra.mxu1 %vm724_vm1, %v925_v40  ;;  %1984 = vmatprep.mubr.msk.f32.mxu1 %vm724_vm1, %v919_v46 }
 0x385   : > { %1982 = vmatprep.subr.msk.mxu1 %vm724_vm1, %v923_v45 }
 0x388   : > { %1983 = vmatpush3.xpose.msk.msra.mxu1 %vm724_vm1, %v923_v45 }
 0x38b   : > { %1985 = vmatmul.mubr.msk.f32.vlgmr.msra.gmra.mxu1 %vm724_vm1, %v921_v53 }
 0x443   : > { %v1979_v54 = vpop.f32.mrf.mxu1 }
 0x444   : > { %917 = vst.msk [vmem:[#allocation4 + $0x8] sm:$0xff] %vm724_vm1, %v1979_v54 }
 0x445   : > { %v907_v55 = vpop.f32.mrf.mxu1 }
 0x446   : > { %916 = vst.msk [vmem:[#allocation4] sm:$0xff] %vm724_vm1, %v907_v55 }
 0x44b   : > { %v1986_v56 = vpop.f32.mrf.mxu1 }
 0x44c   : > { %v1012_v57 = vsel %vm812_vm2, %v1986_v56, -inf }
 0x44d   : > { %1013 = vmax.xlane.f32.xlu1 %v1012_v57  ;;  %v1000_v58 = vpop.f32.mrf.mxu1 }
 0x44e   : > { %v1009_v59 = vsel %vm812_vm2, %v1000_v58, -inf }
 0x44f   : > { %1010 = vmax.xlane.f32.xlu0 %v1009_v59 }
 0x45e   : > { %1033 = vrot.lane.b32.xlu1 %v2825_v29, %s2480_s13 }
 0x462   : > { %1137 = vrot.lane.b32.xlu1 %v2795_v21, %s2481_s15 }
 0x466   : > { %1135 = vrot.lane.b32.xlu1 %v2801_v23, %s2481_s15 }
 0x46a   : > { %1133 = vrot.lane.b32.xlu1 %v2813_v25, %s2481_s15 }
 0x4d6   : > { %v1014_v60 = vpop.xlane.xlu1 %1013 }
 0x4d7   : > { %v1016_v61 = vsub.f32 %v1986_v56, %v1014_v60 }
 0x4d8   : > { %v1011_v62 = vpop.xlane.xlu0 %1010 }
 0x4d9   : > { %v1019_v63 = vmul.f32 1.442695, %v1016_v61  ;;  %v1015_v0 = vsub.f32 %v1000_v58, %v1011_v62 }
 0x4da   : > { %v1034_v8 = vpop.permute.xlu1 %1033 }
 0x4db   : > { %2165 = vpow2.f32 %v1019_v63  ;;  %v1017_v1 = vmul.f32 1.442695, %v1015_v0 }
 0x4dd   : > { %2167 = vpow2.f32 %v1017_v1 }
 0x4de   : > { %v1138_v10 = vpop.permute.xlu1 %1137 }
 0x4e2   : > { %v1136_v16 = vpop.permute.xlu1 %1135 }
 0x4e6   : > { %v1134_v17 = vpop.permute.xlu1 %1133 }
 0x4e8   : > { %v2166_v2 = vpop.eup %2165 }
 0x4e9   : > { %v1024_v3 = vsel %vm812_vm2, %v2166_v2, 0.0 }
 0x4ea   : > { %v2168_v4 = vpop.eup %2167  ;;  %1025 = vadd.xlane.f32.xlu0 %v1024_v3 }
 0x4eb   : > { %v1021_v5 = vsel %vm812_vm2, %v2168_v4, 0.0 }
 0x4ee   : > { %1022 = vadd.xlane.f32.xlu0 %v1021_v5 }
 0x504   : > { %1035 = vrot.lane.b32.xlu0 %v2821_v28, %s2480_s13  ;;  %s2486_s13 = smov [#allocation17]  }
 0x508   : > { %1131 = vrot.lane.b32.xlu0 %v2803_v24, %s2481_s15 }
 0x573   : > { %v1026_v6 = vpop.xlane.xlu0 %1025 }
 0x574   : > { %2169 = vrcp.f32 %v1026_v6 }
 0x577   : > { %v1023_v7 = vpop.xlane.xlu0 %1022 }
 0x578   : > { %2171 = vrcp.f32 %v1023_v7 }
 0x57b   : > { %v1036_v9 = vpop.permute.xlu0 %1035 }
 0x57c   : > { %1987 = vmatprep.subr.mxu0 %v1036_v9 }
 0x57d   : > { %1988 = vmatpush3.msra.mxu0 %v1036_v9 }
 0x57e   : > { %1989 = vmatprep.subr.mxu0 %v1034_v8 }
 0x57f   : > { %1990 = vmatpush3.msra.mxu0 %v1034_v8  ;;  %v1132_v15 = vpop.permute.xlu0 %1131 }
 0x580   : > { %1994 = vmatprep.subr.msk.mxu0 %vm724_vm1, %v1138_v10 }
 0x581   : > { %v2170_v11 = vpop.eup %2169 }
 0x582   : > { %v1030_v14 = vmul.f32 %v2170_v11, %v2166_v2  ;;  %v1557_v11 = vld [vmem:[#allocation16 + $0x10] sm:$0xff] }
 0x585   : > { %v2172_v12 = vpop.eup %2171 }
 0x586   : > { %v1029_v13 = vmul.f32 %v2172_v12, %v2168_v4  ;;  %v1556_v12 = vld [vmem:[#allocation16 + $0x8] sm:$0xff] }
 0x588   : > { %1991 = vmatprep.mubr.msk.f32.mxu0 %vm812_vm2, %v1029_v13  ;;  %v1555_v13 = vld [vmem:[#allocation16] sm:$0xff] }
 0x589   : > { %1992 = vmatmul.mubr.msk.f32.vlgmr.msra.gmra.mxu0 %vm812_vm2, %v1030_v14 }
 0x58a   : > { %1995 = vmatpush3.xpose.msk.msra.mxu0 %vm724_vm1, %v1138_v10  ;;  %1998 = vmatprep.mubr.msk.f32.mxu0 %vm724_vm1, %v1132_v15 }
 0x58b   : > { %1996 = vmatprep.subr.msk.mxu0 %vm724_vm1, %v1136_v16 }
 0x58e   : > { %1997 = vmatpush3.xpose.msk.msra.mxu0 %vm724_vm1, %v1136_v16 }
 0x591   : > { %1999 = vmatmul.mubr.msk.f32.vlgmr.msra.gmra.mxu0 %vm724_vm1, %v1134_v17 }
 0x649   : > { %v2871_v18 = vpop.f32.mrf.mxu0 }
 0x64b   : > { %v2873_v19 = vpop.f32.mrf.mxu0 }
 0x651   : > { %v2000_v20 = vpop.f32.mrf.mxu0 }
 0x652   : > { %v1225_v22 = vsel %vm812_vm2, %v2000_v20, -inf }
 0x653   : > { %1226 = vmax.xlane.f32.xlu1 %v1225_v22  ;;  %v1213_v26 = vpop.f32.mrf.mxu0 }
 0x654   : > { %v1222_v27 = vsel %vm812_vm2, %v1213_v26, -inf }
 0x655   : > { %1223 = vmax.xlane.f32.xlu0 %v1222_v27 }
 0x664   : > { %1244 = vrot.lane.b32.xlu1 %v2825_v29, %s2481_s15 }
 0x668   : > { %1348 = vrot.lane.b32.xlu1 %v2795_v21, %s2482_s18 }
 0x66c   : > { %1346 = vrot.lane.b32.xlu1 %v2801_v23, %s2482_s18 }
 0x670   : > { %1344 = vrot.lane.b32.xlu1 %v2813_v25, %s2482_s18 }
 0x6dc   : > { %v1227_v30 = vpop.xlane.xlu1 %1226 }
 0x6dd   : > { %v1229_v31 = vsub.f32 %v2000_v20, %v1227_v30  ;;  %v1865_v20 = vld [vmem:[%s2986_s7] ss:$0 sm:$0xff] }
 0x6de   : > { %v1224_v32 = vpop.xlane.xlu0 %1223 }
 0x6df   : > { %v1232_v33 = vmul.f32 1.442695, %v1229_v31  ;;  %v1228_v34 = vsub.f32 %v1213_v26, %v1224_v32 }
 0x6e0   : > { %v1245_v39 = vpop.permute.xlu1 %1244 }
 0x6e1   : > { %2173 = vpow2.f32 %v1232_v33  ;;  %v1230_v35 = vmul.f32 1.442695, %v1228_v34 }
 0x6e3   : > { %2175 = vpow2.f32 %v1230_v35 }
 0x6e4   : > { %v1349_v41 = vpop.permute.xlu1 %1348 }
 0x6e8   : > { %v1347_v46 = vpop.permute.xlu1 %1346 }
 0x6ec   : > { %v1345_v47 = vpop.permute.xlu1 %1344 }
 0x6ee   : > { %v2174_v36 = vpop.eup %2173 }
 0x6ef   : > { %v1237_v37 = vsel %vm812_vm2, %v2174_v36, 0.0 }
 0x6f0   : > { %v2176_v38 = vpop.eup %2175  ;;  %1238 = vadd.xlane.f32.xlu0 %v1237_v37 }
 0x6f1   : > { %v1234_v21 = vsel %vm812_vm2, %v2176_v38, 0.0 }
 0x6f4   : > { %1235 = vadd.xlane.f32.xlu0 %v1234_v21 }
 0x70a   : > { %1246 = vrot.lane.b32.xlu0 %v2821_v28, %s2481_s15  ;;  %s2381_s15 = sshll.u32 %s2486_s13, 4  ;;  %s2382_s15 = int_to_ptr.vmem [resolvable:$false] %s2381_s15 }
 0x70b   : > { %p2384_p0 = scmp.lt.s32.totalorder %s2922_s25, %s2382_s15 }
 0x70e   : > { %1342 = vrot.lane.b32.xlu0 %v2803_v24, %s2482_s18 }
 0x779   : > { %v1239_v23 = vpop.xlane.xlu0 %1238 }
 0x77a   : > { %2177 = vrcp.f32 %v1239_v23 }
 0x77d   : > { %v1236_v25 = vpop.xlane.xlu0 %1235 }
 0x77e   : > { %2179 = vrcp.f32 %v1236_v25 }
 0x781   : > { %v1247_v40 = vpop.permute.xlu0 %1246 }
 0x782   : > { %2001 = vmatprep.subr.mxu1 %v1247_v40 }
 0x783   : > { %2002 = vmatpush3.msra.mxu1 %v1247_v40 }
 0x784   : > { %2003 = vmatprep.subr.mxu1 %v1245_v39 }
 0x785   : > { %2004 = vmatpush3.msra.mxu1 %v1245_v39  ;;  %v1343_v24 = vpop.permute.xlu0 %1342 }
 0x786   : > { %2008 = vmatprep.subr.msk.mxu1 %vm724_vm1, %v1349_v41 }
 0x787   : > { %v2178_v42 = vpop.eup %2177 }
 0x788   : > { %v1243_v45 = vmul.f32 %v2178_v42, %v2174_v36 }
 0x78b   : > { %v2180_v43 = vpop.eup %2179 }
 0x78c   : > { %v1242_v44 = vmul.f32 %v2180_v43, %v2176_v38 }
 0x78e   : > { %2005 = vmatprep.mubr.msk.f32.mxu1 %vm812_vm2, %v1242_v44 }
 0x78f   : > { %2006 = vmatmul.mubr.msk.f32.vlgmr.msra.gmra.mxu1 %vm812_vm2, %v1243_v45 }
 0x790   : > { %2009 = vmatpush3.xpose.msk.msra.mxu1 %vm724_vm1, %v1349_v41  ;;  %2012 = vmatprep.mubr.msk.f32.mxu1 %vm724_vm1, %v1343_v24 }
 0x791   : > { %2010 = vmatprep.subr.msk.mxu1 %vm724_vm1, %v1347_v46 }
 0x794   : > { %2011 = vmatpush3.xpose.msk.msra.mxu1 %vm724_vm1, %v1347_v46 }
 0x797   : > { %2013 = vmatmul.mubr.msk.f32.vlgmr.msra.gmra.mxu1 %vm724_vm1, %v1345_v47 }
 0x84f   : > { %v2007_v48 = vpop.f32.mrf.mxu1 }
 0x851   : > { %v1322_v49 = vpop.f32.mrf.mxu1 }
 0x857   : > { %v2014_v50 = vpop.f32.mrf.mxu1 }
 0x858   : > { %v1436_v51 = vsel %vm812_vm2, %v2014_v50, -inf }
 0x859   : > { %1437 = vmax.xlane.f32.xlu1 %v1436_v51  ;;  %v1424_v52 = vpop.f32.mrf.mxu1 }
 0x85a   : > { %v1433_v53 = vsel %vm812_vm2, %v1424_v52, -inf }
 0x85b   : > { %1434 = vmax.xlane.f32.xlu0 %v1433_v53 }
 0x86a   : > { %1455 = vrot.lane.b32.xlu1 %v2825_v29, %s2482_s18 }
 0x86e   : > { %1122 = vrot.lane.b32.xlu1 %v2873_v19, %s2483_s16 }
 0x872   : > { %1124 = vrot.lane.b32.xlu1 %v2871_v18, %s2483_s16 }
 0x876   : > { %1335 = vrot.lane.b32.xlu1 %v2007_v48, %s2484_s14 }
 0x8e2   : > { %v1438_v54 = vpop.xlane.xlu1 %1437 }
 0x8e3   : > { %v1440_v55 = vsub.f32 %v2014_v50, %v1438_v54 }
 0x8e4   : > { %v1435_v56 = vpop.xlane.xlu0 %1434 }
 0x8e5   : > { %v1443_v57 = vmul.f32 1.442695, %v1440_v55  ;;  %v1439_v58 = vsub.f32 %v1424_v52, %v1435_v56 }
 0x8e6   : > { %v1456_v59 = vpop.permute.xlu1 %1455 }
 0x8e7   : > { %2181 = vpow2.f32 %v1443_v57  ;;  %v1441_v60 = vmul.f32 1.442695, %v1439_v58 }
 0x8e9   : > { %2183 = vpow2.f32 %v1441_v60 }
 0x8ea   : > { %v1123_v29 = vpop.permute.xlu1 %1122 }
 0x8eb   : > { %1129 = vst.msk [vmem:[#allocation4] sm:$0xff] %vm1128_vm3, %v1123_v29 }
 0x8ee   : > { %v1125_v61 = vpop.permute.xlu1 %1124 }
 0x8ef   : > { %1130 = vst.msk [vmem:[#allocation4 + $0x8] sm:$0xff] %vm1128_vm3, %v1125_v61 }
 0x8f2   : > { %v1336_v62 = vpop.permute.xlu1 %1335 }
 0x8f3   : > { %1341 = vst.msk [vmem:[#allocation4 + $0x8] sm:$0xff] %vm1339_vm4, %v1336_v62 }
 0x8f4   : > { %v2182_v63 = vpop.eup %2181 }
 0x8f5   : > { %v1448_v0 = vsel %vm812_vm2, %v2182_v63, 0.0 }
 0x8f6   : > { %v2184_v1 = vpop.eup %2183  ;;  %1449 = vadd.xlane.f32.xlu0 %v1448_v0 }
 0x8f7   : > { %v1445_v2 = vsel %vm812_vm2, %v2184_v1, 0.0 }
 0x8fa   : > { %1446 = vadd.xlane.f32.xlu0 %v1445_v2 }
 0x910   : > { %1457 = vrot.lane.b32.xlu0 %v2821_v28, %s2482_s18  ;;  %v1558_v28 = vld [vmem:[#allocation16 + $0x18] sm:$0xff]  ;;  %s2383_s18 = scalar_lea.vmem %s2382_s15, 512 }
 0x911   : > { %p2385_p13 = scmp.lt.s32.totalorder %s2383_s18, %s2377_s22 }
 0x913   : > { %p2386_p11 = por %p2385_p13, %p2384_p0 }
 0x914   : > { %1333 = vrot.lane.b32.xlu0 %v1322_v49, %s2484_s14 }
 0x915   : > { %p2387_p1 = pnand %p2386_p11, %p2380_p12 }
 0x97f   : > { %v1450_v3 = vpop.xlane.xlu0 %1449 }
 0x980   : > { %2185 = vrcp.f32 %v1450_v3 }
 0x983   : > { %v1447_v4 = vpop.xlane.xlu0 %1446 }
 0x984   : > { %2187 = vrcp.f32 %v1447_v4 }
 0x987   : > { %v1458_v5 = vpop.permute.xlu0 %1457 }
 0x988   : > { %2015 = vmatprep.subr.mxu0 %v1458_v5 }
 0x989   : > { %2016 = vmatpush3.msra.mxu0 %v1458_v5 }
 0x98a   : > { %2017 = vmatprep.subr.mxu0 %v1456_v59 }
 0x98b   : > { %2018 = vmatpush3.msra.mxu0 %v1456_v59  ;;  %v1334_v6 = vpop.permute.xlu0 %1333 }
 0x98c   : > { %1340 = vst.msk [vmem:[#allocation4] sm:$0xff] %vm1339_vm4, %v1334_v6  ;;  %2022 = vmatprep.subr.mxu0 %v1558_v28 }
 0x98d   : > { %v2186_v7 = vpop.eup %2185 }
 0x98e   : > { %v1454_v10 = vmul.f32 %v2186_v7, %v2182_v63 }
 0x991   : > { %v2188_v8 = vpop.eup %2187 }
 0x992   : > { %v1453_v9 = vmul.f32 %v2188_v8, %v2184_v1 }
 0x994   : > { %2019 = vmatprep.mubr.msk.f32.mxu0 %vm812_vm2, %v1453_v9 }
 0x995   : > { %2020 = vmatmul.mubr.msk.f32.vlgmr.msra.gmra.mxu0 %vm812_vm2, %v1454_v10 }
 0x996   : > { %2023 = vmatpush3.msra.mxu0 %v1558_v28 }
 0x997   : > { %2024 = vmatprep.subr.mxu0 %v1557_v11 }
 0x998   : > { %2025 = vmatpush3.msra.mxu0 %v1557_v11 }
 0x999   : > { %2026 = vmatprep.subr.mxu0 %v1556_v12 }
 0x99a   : > { %2027 = vmatpush3.msra.mxu0 %v1556_v12 }
 0x99b   : > { %2028 = vmatprep.subr.mxu0 %v1555_v13 }
 0x99c   : > { %2029 = vmatpush3.msra.mxu0 %v1555_v13 }
 0xa55   : > { %v2021_v14 = vpop.f32.mrf.mxu0 }
 0xa56   : > { %1546 = vrot.lane.b32.xlu1 %v2021_v14, %s2485_s1 }
 0xa57   : > { %v1533_v15 = vpop.f32.mrf.mxu0 }
 0xa58   : > { %1544 = vrot.lane.b32.xlu0 %v1533_v15, %s2485_s1 }
 0xac8   : > { %v1547_v16 = vpop.permute.xlu1 %1546 }
 0xac9   : > { %1552 = vst.msk [vmem:[#allocation4 + $0x8] sm:$0xff] %vm1550_vm5, %v1547_v16 }
 0xaca   : > { %v1545_v17 = vpop.permute.xlu0 %1544 }
 0xacb   : > { %1551 = vst.msk [vmem:[#allocation4] sm:$0xff] %vm1550_vm5, %v1545_v17 }
 0xad0   : > { %v1554_v19 = vld [vmem:[#allocation4 + $0x8] sm:$0xff] }
 0xad2   : > { %v1553_v18 = vld [vmem:[#allocation4] sm:$0xff] }
 0xad3   : > { %2030 = vmatprep.mubr.msk.f32.mxu0 %vm459_vm0, %v1553_v18 }
 0xad4   : > { %2031 = vmatmul.mubr.msk.f32.vlgmr.msra.gmra.mxu0 %vm459_vm0, %v1554_v19 }
 0xb94   : > { %v2032_v22 = vpop.f32.mrf.mxu0 }
 0xb95   : > { %v1644_v26 = vadd.f32 %v2032_v22, %v1865_v20 }
 0xb96   : > { %v1638_v27 = vpop.f32.mrf.mxu0 }
 0xb97   : > { %1648 = vst.msk [vmem:[%s444_s11 + $0x8] sm:$0xff] %vm459_vm0, %v1644_v26  ;;  %v1639_v30 = vadd.f32 %v1865_v20, %v1638_v27 }
 0xb99   : > { %1647 = vst.msk [vmem:[%s444_s11] sm:$0xff] %vm459_vm0, %v1639_v30 }
 0xb9a   : > { %2390 = shalt.err (!%p2387_p1)
}
 0xb9b   : > { %s2391_s17 = scalar_lea.hbm %s2929_s30, 256  ;;  %s2395_s23 = scalar_lea.hbm %s2987_s8, 512 }
 0xb9c   : > { %p2392_p9 = scmp.ne.s32.totalorder %s2929_s30, %s2391_s17  ;;  %p2396_p4 = scmp.lt.s32.totalorder %s2929_s30, %s2987_s8 }
 0xb9d   : > { %p2397_p10 = scmp.lt.s32.totalorder %s2395_s23, %s2391_s17 }
 0xb9e   : > { %p2393_p3 = pnand %p2392_p9, %p2728_p8 }
 0xb9f   : > { %p2398_p5 = por %p2397_p10, %p2396_p4 }
 0xba0   : > { %p2394_p2 = pneg %p2393_p3 }
 0xba2   : > { %p2399_p7 = pnand %p2398_p5, %p2394_p2 }
 0xba4   : > { %2402 = shalt.err (!%p2399_p7)
}
 0xba5   : > { %s2487_s12 = smov 128  }
 0xba6   : > { %2055 = dma.vmem_to_hbm [thread:$0]  (%p2728_p8), %s2922_s25, 256, %s2929_s30, %s1650_s19, %s2487_s12, %s2487_s12, %s2483_s16  }
 0xba7 PF: > { %s3029_s26 = sld [smem:[#allocation23_spill]]  ;;  %p3032_p12 = scmp.ge.s32.totalorder %s2469_s10, 2 }
 0xba8   : > { %s3030_s22 = sld [smem:[#allocation24_spill]] }
 0xbad   : > { %s1680_s13 = sand.u32 1, %s3029_s26  }
 0xbae   : > { %p3031_p6 = scmp.ne.s32.totalorder %s3030_s22, 0  ;;  %s1681_s15 = scalar_lea.sflag [#allocation7], %s1680_s13 }
 0xbb0   : > { %p2081_p0 = pnand %p3032_p12, %p3031_p6 }
 0xbb2   : > { %p2082_p13 = pneg %p2081_p0 }
 0xbb4   : > { %2444 = dma.done.wait (%p2082_p13), %s1681_s15, 256  }
 0xbb5   : > { %2446 = vsyncadd (%p2082_p13), %s1681_s15, 4294967040  ;;  %s27_s10 = sadd.s32 1, %s2469_s10   ;;  %s3033_s27 = smov %s2453_s28 }
 0xbb6   : > { %p24_p11 = scmp.ge.s32.totalorder %s27_s10, 4   ;;  %s3034_s28 = smov %s2457_s29 }
 0xbb7   : > { %s3035_s29 = smov %s2740_s21  ;;  %s3036_s30 = smov %s2465_s9 }
 0xbb8   : > { %s3037_s9 = smov %s3039_s20  ;;  %26 = sbr.rel (!%p24_p11) target bundleno = 12 (0xc), region = 127 }
 0xbbd   :  { %1686 = vsyncpa [#allocation6], 1 }
 0xbbe   :  { %1688 = vsyncpa [#allocation6 + $0x1], 1 }
 0xbbf   :  { %1689 = vsyncpa [#allocation9], 1 }
 0xbc0   :  { %1690 = vsyncpa [#allocation12], 1 }
 0xbc1   :  { %1691 = vsyncpa [#allocation15], 1 }
 0xbc2   :  { %1692 = vsyncpa [#allocation7], 1 }
 0xbc3   :  { %1694 = vsyncpa [#allocation7 + $0x1], 1 }

// kernel: tpu_custom_call.1
= control target key start
LH: loop header
LB: loop body
LE: loop exit
PB: predicated region body
PF: predicated region fallthrough
CT: control target
= control target key end

     0   :  { %s3008_s0 = inlined_call_operand.hbm [shape: f32[2,16,32], index: 0, kind: input, shape index: {}]   ;;  %s3009_s1 = inlined_call_operand.hbm [shape: f32[2,16,32], index: 1, kind: input, shape index: {}]   ;;  %s3010_s2 = inlined_call_operand.hbm [shape: f32[2,16,32], index: 2, kind: input, shape index: {}]   ;;  %s3011_s3 = inlined_call_operand.hbm [shape: f32[32,32], index: 3, kind: input, shape index: {}]   ;;  %s3012_s4 = inlined_call_operand.hbm [shape: f32[32,32], index: 4, kind: input, shape index: {}]   ;;  %s3013_s5 = inlined_call_operand.hbm [shape: f32[32,32], index: 5, kind: input, shape index: {}]   ;;  %s3014_s6 = inlined_call_operand.hbm [shape: f32[32,32], index: 6, kind: input, shape index: {}]   ;;  %s3015_s7 = inlined_call_operand.vmem [shape: f32[1,32], index: 7, kind: input, shape index: {}]   ;;  %s3016_s8 = inlined_call_operand.hbm [shape: f32[2,16,32], index: 8, kind: output, shape index: {}]  }
   0x1   :  { %3031 = sst [smem:[#allocation29_spill]] %s3009_s1 }
   0x2   :  { %3032 = sst [smem:[#allocation30_spill]] %s3011_s3 }
   0x3   :  { %3033 = sst [smem:[#allocation31_spill]] %s3012_s4 }
   0x4   :  { %3034 = sst [smem:[#allocation32_spill]] %s3013_s5 }
   0x5   :  { %13 = vsyncpa [#allocation6], 0 }
   0x6   :  { %15 = vsyncpa [#allocation6 + $0x1], 0 }
   0x7   :  { %16 = vsyncpa [#allocation9], 0 }
   0x8   :  { %18 = vsyncpa [#allocation9 + $0x1], 0 }
   0x9   :  { %19 = vsyncpa [#allocation12], 0 }
   0xa   :  { %20 = vsyncpa [#allocation15], 0 }
   0xb   :  { %21 = vsyncpa [#allocation7], 0 }
   0xc   :  { %23 = vsyncpa [#allocation7 + $0x1], 0  ;;  %s2587_s27 = smov 0   ;;  %s2589_s28 = smov 0  }
   0xd   :  { %s2591_s29 = smov 0   ;;  %s2593_s30 = smov 0  }
   0xe   :  { %s2595_s9 = smov 0   ;;  %s2597_s10 = smov 0  }
   0xf LB: > { %3035 = sst [smem:[#allocation23_spill]] %s2503_s27  ;;  %s2618_s11 = sadd.s32 4294967295, %s2523_s10   ;;  %s2523_s10 = sphi %s2597_s10, %s29_s10   ;;  %s2519_s9 = sphi %s2595_s9, %s3069_s9   ;;  %s2515_s30 = sphi %s2593_s30, %s3068_s30   ;;  %s2511_s29 = sphi %s2591_s29, %s3072_s29   ;;  %s2507_s28 = sphi %s2589_s28, %s3071_s28   ;;  %s2503_s27 = sphi %s2587_s27, %s3070_s27  }
  0x10   : > { %3036 = sst [smem:[#allocation24_spill]] %s2519_s9  ;;  %s1866_s12 = sadd.s32 4294967294, %s2523_s10  }
  0x11   : > { %3037 = sst [smem:[#allocation25_spill]] %s2523_s10  ;;  %p63_p0 = scmp.ne.s32.totalorder %s2507_s28, %s2503_s27 }
  0x12   : > { %p3017_p1 = scmp.eq.s32.totalorder %s2618_s11, 0  ;;  %p246_p2 = scmp.eq.s32.totalorder %s2618_s11, 1 }
  0x13   : > { %p252_p3 = scmp.eq.s32.totalorder %s1866_s12, 1  ;;  %p1867_p5 = scmp.ge.s32.totalorder %s2523_s10, 1 }
  0x14   : > { %p2627_p4 = por %p3017_p1, %p63_p0  ;;  %p259_p7 = scmp.lt.s32.totalorder %s2523_s10, 3 }
  0x15   : > { %p2632_p6 = por %p252_p3, %p63_p0  ;;  %s2525_s16 = smov [#allocation11]  }
  0x16   : > { %p2637_p8 = pnand %p1867_p5, %p259_p7  ;;  %s271_s17 = sshll.u32 %s2525_s16, 4  ;;  %s272_s17 = int_to_ptr.vmem [resolvable:$true] %s271_s17 }
  0x17   : > { %s3039_s14 = scalar_select %p2632_p6, 1, 0 }
  0x18   : > { %p2113_p9 = pneg %p2637_p8  ;;  %s2526_s19 = smov [#allocation14]  }
  0x19   : > { %3040 = sst [smem:[#allocation26_spill]] %s3039_s14  ;;  %s297_s20 = sshll.u32 %s2526_s19, 4  ;;  %s298_s20 = int_to_ptr.vmem [resolvable:$true] %s297_s20 }
  0x1a   : > { %p2646_p11 = pnand %p2113_p9, %p3017_p1  ;;  %s2254_s21 = scalar_lea.vmem %s272_s17, 512 }
  0x1b   : > { %p2255_p13 = scmp.ne.s32.totalorder %s272_s17, %s2254_s21  ;;  %p2262_p5 = scmp.lt.s32.totalorder %s272_s17, %s272_s17 }
  0x1c   : > { %p3027_p12 = pneg %p2646_p11  ;;  %p2263_p7 = scmp.lt.s32.totalorder %s2254_s21, %s2254_s21 }
  0x1e   : > { %p2257_p0 = pnand %p2255_p13, %p3027_p12  ;;  %p2264_p10 = por %p2263_p7, %p2262_p5 }
  0x20   : > { %p2258_p3 = pneg %p2257_p0 }
  0x22   : > { %p2265_p9 = pnand %p2264_p10, %p2258_p3 }
  0x24   : > { %2268 = shalt.err (!%p2265_p9)
}
  0x25   : > { %s3018_s22 = smov 128   ;;  %s3020_s23 = smov 8  }
  0x26   : > { %s3043_s3 = sld [smem:[#allocation30_spill]]  ;;  %s2280_s26 = scalar_lea.vmem %s298_s20, 512 }
  0x27   : > { %p2281_p13 = scmp.ne.s32.totalorder %s298_s20, %s2280_s26  ;;  %p2288_p10 = scmp.lt.s32.totalorder %s298_s20, %s298_s20 }
  0x28   : > { %p2289_p3 = scmp.lt.s32.totalorder %s2280_s26, %s2280_s26 }
  0x29   : > { %p2283_p0 = pnand %p2281_p13, %p3027_p12 }
  0x2a   : > { %p2290_p7 = por %p2289_p3, %p2288_p10 }
  0x2b   : > { %p2284_p5 = pneg %p2283_p0 }
  0x2c   : > { %2116 = dma.hbm_to_vmem [thread:$0]  (!%p2646_p11), %s3043_s3, 512, %s272_s17, [#allocation12], %s3018_s22, %s3018_s22, %s3020_s23  }
  0x2d   : > { %p2291_p9 = pnand %p2290_p7, %p2284_p5 }
  0x2f   : > { %2294 = shalt.err (!%p2291_p9)
}
  0x30   : > { %s3044_s5 = sld [smem:[#allocation32_spill]]  ;;  %s41_s17 = sadd.s32 1, %s2519_s9 }
  0x31   : > { %s50_s19 = sadd.s32 1, %s2511_s29  ;;  %p43_p13 = scmp.ge.s32.totalorder %s41_s17, 2 }
  0x32   : > { %p57_p0 = scmp.ne.s32.totalorder %s2511_s29, %s2507_s28  ;;  %p58_p5 = scmp.eq.s32.totalorder %s2523_s10, 0 }
  0x33   : > { %p2144_p10 = scmp.lt.s32.totalorder %s2523_s10, 2  ;;  %s3074_s17 = smov (%p43_p13, %s41_s17), 0 }
  0x34   : > { %3045 = sst [smem:[#allocation27_spill]] %s3074_s17  ;;  %p59_p3 = por %p58_p5, %p57_p0 }
  0x35   : > { %p2684_p7 = por %p246_p2, %p57_p0  ;;  %s45_s24 = ssub.s32 %s2519_s9, %s3074_s17 }
  0x36   : > { %2122 = dma.hbm_to_vmem [thread:$0]  (!%p2646_p11), %s3044_s5, 512, %s298_s20, [#allocation15], %s3018_s22, %s3018_s22, %s3020_s23  }
  0x37   : > { %s3022_s25 = sand.u32 1, %s2511_s29   ;;  %p48_p9 = scmp.eq.s32.totalorder %s45_s24, 0 }
  0x38   : > { %s2693_s20 = sshll.u32 %s3022_s25, 4  ;;  %s2696_s26 = sshll.u32 %s2519_s9, 8 }
  0x39   : > { %p2698_p1 = pnand %p2144_p10, %p59_p3  ;;  %s350_s22 = sand.u32 1, %s2523_s10  }
  0x3a   : > { %s2703_s16 = scalar_select %p48_p9, %s2511_s29, %s50_s19  }
  0x3b   : > { %s3049_s1 = sld [smem:[#allocation29_spill]]  ;;  %s354_s5 = scalar_lea.vmem [#allocation8], %s2693_s20 }
  0x3c   : > { %3048 = sst [smem:[#allocation28_spill]] %s2703_s16  ;;  %s361_s25 = sshll.u32 %s354_s5, 4  ;;  %s362_s25 = int_to_ptr.vmem [resolvable:$true] %s361_s25 }
  0x3d   : > { %s2711_s17 = scalar_lea.sflag [#allocation9], %s350_s22  ;;  %p3029_p2 = pneg %p2698_p1 }
  0x3e   : > { %s2308_s9 = scalar_lea.vmem %s362_s25, 256  ;;  %s2529_s19 = smov [#allocation8]  }
  0x3f   : > { %p2309_p13 = scmp.ne.s32.totalorder %s362_s25, %s2308_s9  ;;  %s2313_s16 = sshll.u32 %s2529_s19, 4  ;;  %s2314_s16 = int_to_ptr.vmem [resolvable:$false] %s2313_s16 }
  0x40   : > { %s2315_s10 = scalar_lea.vmem %s2314_s16, 512  ;;  %p2316_p10 = scmp.lt.s32.totalorder %s362_s25, %s2314_s16 }
  0x41   : > { %s360_s24 = scalar_lea.hbm %s3049_s1, %s2696_s26  ;;  %p2311_p0 = pnand %p2309_p13, %p3029_p2 }
  0x42   : > { %p2317_p3 = scmp.lt.s32.totalorder %s2315_s10, %s2308_s9 }
  0x43   : > { %p2312_p5 = pneg %p2311_p0 }
  0x44   : > { %p2318_p9 = por %p2317_p3, %p2316_p10 }
  0x46   : > { %p2319_p12 = pnand %p2318_p9, %p2312_p5 }
  0x48   : > { %2322 = shalt.err (!%p2319_p12)
}
  0x49   : > { %s3050_s3 = smov 8   ;;  %s3051_s5 = smov 128  }
  0x4a   : > { %2132 = dma.hbm_to_vmem [thread:$0]  (!%p2698_p1), %s360_s24, 256, %s362_s25, %s2711_s17, %s3051_s5, %s3051_s5, %s3050_s3  }
  0x4b   : > { %s2530_s22 = smov [#allocation13]   ;;  %s2531_s1 = smov [#allocation16]  }
  0x4c   : > { %s284_s23 = sshll.u32 %s2530_s22, 4  ;;  %s310_s19 = sshll.u32 %s2531_s1, 4  ;;  %s285_s23 = int_to_ptr.vmem [resolvable:$true] %s284_s23  ;;  %s311_s19 = int_to_ptr.vmem [resolvable:$true] %s310_s19 }
  0x4d   : > { %s2334_s14 = scalar_lea.vmem %s285_s23, 512  ;;  %p3052_p0 = pneg %p2646_p11 }
  0x4e   : > { %p2335_p13 = scmp.ne.s32.totalorder %s285_s23, %s2334_s14  ;;  %p2342_p12 = scmp.lt.s32.totalorder %s285_s23, %s285_s23 }
  0x4f   : > { %p2343_p3 = scmp.lt.s32.totalorder %s2334_s14, %s2334_s14 }
  0x50   : > { %p2337_p10 = pnand %p2335_p13, %p3052_p0 }
  0x51   : > { %p2344_p9 = por %p2343_p3, %p2342_p12 }
  0x52   : > { %p2338_p5 = pneg %p2337_p10 }
  0x54   : > { %p2345_p2 = pnand %p2344_p9, %p2338_p5 }
  0x56   : > { %2348 = shalt.err (!%p2345_p2)
}
  0x57   : > { %s3053_s4 = sld [smem:[#allocation31_spill]]  ;;  %s2360_s1 = scalar_lea.vmem %s311_s19, 512 }
  0x58   : > { %p2361_p6 = scmp.ne.s32.totalorder %s311_s19, %s2360_s1  ;;  %p3054_p13 = pmov %p3052_p0 }
  0x59   : > { %p2368_p12 = scmp.lt.s32.totalorder %s311_s19, %s311_s19  ;;  %p2369_p5 = scmp.lt.s32.totalorder %s2360_s1, %s2360_s1 }
  0x5a   : > { %p2363_p0 = pnand %p2361_p6, %p3054_p13 }
  0x5b   : > { %p2370_p2 = por %p2369_p5, %p2368_p12 }
  0x5c   : > { %p2364_p10 = pneg %p2363_p0 }
  0x5d   : > { %2119 = dma.hbm_to_vmem [thread:$0]  (!%p2646_p11), %s3053_s4, 512, %s285_s23, [#allocation12], %s3051_s5, %s3051_s5, %s3050_s3  }
  0x5e   : > { %p2371_p3 = pnand %p2370_p2, %p2364_p10 }
  0x60   : > { %2374 = shalt.err (!%p2371_p3)
}
  0x61   : > { %2125 = dma.hbm_to_vmem [thread:$0]  (!%p2646_p11), %s3014_s6, 512, %s311_s19, [#allocation15], %s3051_s5, %s3051_s5, %s3050_s3  }
  0x62   : > { %s339_s22 = scalar_lea.hbm %s3008_s0, %s2696_s26  ;;  %s331_s23 = scalar_lea.vmem [#allocation5], %s2693_s20 }
  0x63   : > { %s340_s9 = sshll.u32 %s331_s23, 4  ;;  %s381_s1 = scalar_lea.hbm %s3010_s2, %s2696_s26  ;;  %s341_s9 = int_to_ptr.vmem [resolvable:$true] %s340_s9 }
  0x64   : > { %s3055_s4 = sand.u32 1, %s2511_s29   ;;  %s2388_s14 = scalar_lea.vmem %s341_s9, 256 }
  0x65   : > { %s328_s27 = scalar_lea.sflag [#allocation6], %s3055_s4  ;;  %p2389_p6 = scmp.ne.s32.totalorder %s341_s9, %s2388_s14 }
  0x66   : > { %p3056_p9 = pneg %p2698_p1  ;;  %s2532_s19 = smov [#allocation5]  }
  0x67   : > { %s2393_s25 = sshll.u32 %s2532_s19, 4  ;;  %s2394_s25 = int_to_ptr.vmem [resolvable:$false] %s2393_s25 }
  0x68   : > { %p2391_p13 = pnand %p2389_p6, %p3056_p9  ;;  %s2395_s16 = scalar_lea.vmem %s2394_s25, 512 }
  0x69   : > { %p2396_p11 = scmp.lt.s32.totalorder %s341_s9, %s2394_s25  ;;  %p2397_p10 = scmp.lt.s32.totalorder %s2395_s16, %s2388_s14 }
  0x6a   : > { %p2392_p0 = pneg %p2391_p13 }
  0x6b   : > { %p2398_p12 = por %p2397_p10, %p2396_p11 }
  0x6d   : > { %p2399_p5 = pnand %p2398_p12, %p2392_p0 }
  0x6f   : > { %2402 = shalt.err (!%p2399_p5)
}
  0x70   : > { %2129 = dma.hbm_to_vmem [thread:$0]  (!%p2698_p1), %s339_s22, 256, %s341_s9, %s328_s27, %s3051_s5, %s3051_s5, %s3050_s3  }
  0x71   : > { %s375_s4 = scalar_lea.vmem [#allocation10], %s2693_s20  ;;  %p3057_p3 = pmov %p3056_p9 }
  0x72   : > { %s382_s24 = sshll.u32 %s375_s4, 4  ;;  %s2533_s18 = smov [#allocation10]   ;;  %s383_s24 = int_to_ptr.vmem [resolvable:$true] %s382_s24 }
  0x73   : > { %s2416_s23 = scalar_lea.vmem %s383_s24, 256  ;;  %s2421_s10 = sshll.u32 %s2533_s18, 4  ;;  %s2422_s10 = int_to_ptr.vmem [resolvable:$false] %s2421_s10 }
  0x74   : > { %p2417_p2 = scmp.ne.s32.totalorder %s383_s24, %s2416_s23  ;;  %s2423_s14 = scalar_lea.vmem %s2422_s10, 512 }
  0x75   : > { %p2424_p13 = scmp.lt.s32.totalorder %s383_s24, %s2422_s10  ;;  %p2425_p0 = scmp.lt.s32.totalorder %s2423_s14, %s2416_s23 }
  0x76   : > { %p2419_p6 = pnand %p2417_p2, %p3057_p3 }
  0x77   : > { %p2426_p11 = por %p2425_p0, %p2424_p13 }
  0x78   : > { %p2420_p9 = pneg %p2419_p6 }
  0x7a   : > { %p2427_p10 = pnand %p2426_p11, %p2420_p9 }
  0x7c   : > { %2430 = shalt.err (!%p2427_p10)
}
  0x7d   : > { %2135 = dma.hbm_to_vmem [thread:$0]  (!%p2698_p1), %s381_s1, 256, %s383_s24, %s2711_s17, %s3051_s5, %s3051_s5, %s3050_s3  }
  0x7e   : > { %394 = sbr.rel (%p2637_p8) target bundleno = 2959 (0xb8f), region = 52  ;;  %s2783_s22 = sand.u32 (!%p2637_p8), 1, %s2507_s28  }
  0x7f   : > { %s2786_s12 = sshll.u32 (!%p2637_p8), %s2783_s22, 4  ;;  %s397_s9 = scalar_lea.sflag (!%p2637_p8), [#allocation6], %s2783_s22 }
  0x80   : > { %s400_s19 = scalar_lea.vmem (!%p2637_p8), [#allocation5], %s2786_s12 }
  0x83   : > { %2482 = dma.done.wait (%p2627_p4), %s397_s9, 256  }
  0x84   : > { %2484 = vsyncadd (%p2627_p4), %s397_s9, 4294967040  ;;  %s405_s15 = sand.u32 1, %s2618_s11   ;;  %s409_s26 = scalar_lea.vmem [#allocation8], %s2786_s12 }
  0x85   : > { %s406_s17 = scalar_lea.sflag [#allocation9], %s405_s15 }
  0x86   : > { %2486 = dma.done.wait (%p2627_p4), %s406_s17, 512  }
  0x87   : > { %2488 = vsyncadd (%p2627_p4), %s406_s17, 4294966784  ;;  %s418_s3 = scalar_lea.vmem [#allocation10], %s2786_s12  ;;  %p3058_p1 = scmp.eq.s32.totalorder %s2618_s11, 0 }
  0x89   : > { %2490 = dma.done.wait (%p3058_p1), [#allocation12], 1024   ;;  %p3059_p8 = pmov %p3058_p1 }
  0x8a   : > { %p3060_p12 = pmov %p3058_p1 }
  0x8b   : > { %2492 = vsyncadd (%p3059_p8), [#allocation12], 4294966272 }
  0x8c   : > { %2494 = dma.done.wait (%p3060_p12), [#allocation15], 1024   ;;  %p3061_p5 = pmov %p3058_p1 }
  0x8d   : > { %vm491_vm0 = vcmask 261120   ;;  %v490_v0 = vld [vmem:[#allocation13 + $0x18] sm:$0xff]  ;;  %v489_v1 = vld [vmem:[#allocation13 + $0x10] sm:$0xff]  ;;  %v488_v3 = vld [vmem:[#allocation13 + $0x8] sm:$0xff]  ;;  %vm756_vm1 = vcmask 64512   ;;  %s2534_s11 = smov 120  }
  0x8e   : > { %2496 = vsyncadd (%p3061_p5), [#allocation15], 4294966272  ;;  %1989 = vmatprep.subr.mxu0 %v490_v0  ;;  %v483_v2 = vld [vmem:[%s409_s26] sm:$0xff]  ;;  %v578_v5 = vld [vmem:[#allocation14 + $0x18] sm:$0xff]  ;;  %vm844_vm2 = vcmask 130048   ;;  %s2535_s13 = smov 112  }
  0x8f   : > { %1990 = vmatpush3.msra.mxu0 %v490_v0  ;;  %1997 = vmatprep.mubr.msk.f32.mxu0 %vm491_vm0, %v483_v2  ;;  %v487_v4 = vld [vmem:[#allocation13] sm:$0xff]  ;;  %v484_v6 = vld [vmem:[%s409_s26 + $0x8] sm:$0xff]  ;;  %v666_v9 = vld [vmem:[#allocation11 + $0x10] sm:$0xff]  ;;  %s2536_s5 = smov 104   ;;  %s2537_s1 = smov 8   ;;  %vm1160_vm3 = vcmask 130112  }
  0x90   : > { %1991 = vmatprep.subr.mxu0 %v489_v1  ;;  %2000 = vmatprep.subr.mxu1 %v578_v5  ;;  %v667_v7 = vld [vmem:[#allocation11 + $0x18] sm:$0xff]  ;;  %v662_v8 = vld [vmem:[%s400_s19] sm:$0xff]  ;;  %v665_v10 = vld [vmem:[#allocation11 + $0x8] sm:$0xff]  ;;  %s2538_s25 = smov 16   ;;  %vm1371_vm4 = vcmask 195712   ;;  %s2539_s16 = smov 24  }
  0x91   : > { %1992 = vmatpush3.msra.mxu0 %v489_v1  ;;  %2001 = vmatpush3.msra.mxu1 %v578_v5  ;;  %v664_v11 = vld [vmem:[#allocation11] sm:$0xff]  ;;  %v663_v12 = vld [vmem:[%s400_s19 + $0x8] sm:$0xff]  ;;  %v577_v13 = vld [vmem:[#allocation14 + $0x10] sm:$0xff]  ;;  %vm1582_vm5 = vcmask 261312   ;;  %s476_s23 = scalar_lea.vmem [#allocation17], %s2786_s12  ;;  %s1932_s10 = sshll.u32 %s2515_s30, 8 }
  0x92   : > { %1993 = vmatprep.subr.mxu0 %v488_v3  ;;  %2002 = vmatprep.subr.mxu1 %v577_v13  ;;  %v576_v14 = vld [vmem:[#allocation14 + $0x8] sm:$0xff]  ;;  %v575_v15 = vld [vmem:[#allocation14] sm:$0xff]  ;;  %s1697_s18 = sshll.u32 %s476_s23, 4  ;;  %s2958_s20 = scalar_lea.hbm %s3016_s8, %s1932_s10  ;;  %s2952_s18 = int_to_ptr.vmem [resolvable:$true] %s1697_s18 }
  0x93   : > { %1994 = vmatpush3.msra.mxu0 %v488_v3  ;;  %2003 = vmatpush3.msra.mxu1 %v577_v13  ;;  %v485_v16 = vld [vmem:[%s418_s3] sm:$0xff]  ;;  %v486_v17 = vld [vmem:[%s418_s3 + $0x8] sm:$0xff]  ;;  %s1682_s12 = scalar_lea.sflag [#allocation7], %s2783_s22  ;;  %s2431_s9 = scalar_lea.vmem %s2952_s18, 256 }
  0x94   : > { %1995 = vmatprep.subr.mxu0 %v487_v4  ;;  %2004 = vmatprep.subr.mxu1 %v576_v14  ;;  %p2432_p4 = scmp.ne.s32.totalorder %s2952_s18, %s2431_s9  ;;  %s2540_s30 = smov [#allocation17]  }
  0x95   : > { %1996 = vmatpush3.msra.mxu0 %v487_v4  ;;  %2005 = vmatpush3.msra.mxu1 %v576_v14  ;;  %s2435_s19 = sshll.u32 %s2540_s30, 4  ;;  %s2436_s19 = int_to_ptr.vmem [resolvable:$false] %s2435_s19 }
  0x96   : > { %1998 = vmatmul.mubr.msk.f32.vlgmr.msra.gmra.mxu0 %vm491_vm0, %v484_v6  ;;  %2011 = vmatprep.subr.mxu0 %v667_v7  ;;  %p2433_p2 = pnand %p2432_p4, %p2684_p7  ;;  %s2437_s15 = scalar_lea.vmem %s2436_s19, 512 }
  0x97   : > { %2012 = vmatpush3.msra.mxu0 %v667_v7  ;;  %2019 = vmatprep.mubr.msk.f32.mxu0 %vm491_vm0, %v662_v8  ;;  %p2438_p6 = scmp.lt.s32.totalorder %s2952_s18, %s2436_s19  ;;  %p2439_p9 = scmp.lt.s32.totalorder %s2437_s15, %s2431_s9 }
  0x98   : > { %2013 = vmatprep.subr.mxu0 %v666_v9  ;;  %2008 = vmatprep.mubr.msk.f32.mxu1 %vm491_vm0, %v485_v16  ;;  %p2434_p3 = pneg %p2433_p2 }
  0x99   : > { %2014 = vmatpush3.msra.mxu0 %v666_v9  ;;  %2006 = vmatprep.subr.mxu1 %v575_v15  ;;  %p2440_p13 = por %p2439_p9, %p2438_p6 }
  0x9a   : > { %2015 = vmatprep.subr.mxu0 %v665_v10  ;;  %2007 = vmatpush3.msra.mxu1 %v575_v15 }
  0x9b   : > { %2016 = vmatpush3.msra.mxu0 %v665_v10  ;;  %2009 = vmatmul.mubr.msk.f32.vlgmr.msra.gmra.mxu1 %vm491_vm0, %v486_v17  ;;  %p2441_p0 = pnand %p2440_p13, %p2434_p3 }
  0x9c   : > { %2017 = vmatprep.subr.mxu0 %v664_v11 }
  0x9d   : > { %2018 = vmatpush3.msra.mxu0 %v664_v11 }
  0x9e   : > { %2020 = vmatmul.mubr.msk.f32.vlgmr.msra.gmra.mxu0 %vm491_vm0, %v663_v12 }
 0x156   : > { %v1999_v18 = vpop.f32.mrf.mxu0 }
 0x157   : > { %574 = vst.msk [vmem:[#allocation2 + $0x8] sm:$0xff] %vm491_vm0, %v1999_v18 }
 0x158   : > { %v564_v19 = vpop.f32.mrf.mxu0 }
 0x159   : > { %573 = vst.msk [vmem:[#allocation2] sm:$0xff] %vm491_vm0, %v564_v19 }
 0x15b   : > { %v2010_v26 = vpop.f32.mrf.mxu1 }
 0x15c   : > { %661 = vst.msk [vmem:[#allocation3 + $0x8] sm:$0xff] %vm491_vm0, %v2010_v26 }
 0x15d   : > { %v651_v27 = vpop.f32.mrf.mxu1 }
 0x15e   : > { %v2021_v20 = vpop.f32.mrf.mxu0  ;;  %v2825_v21 = vld [vmem:[#allocation2 + $0x8] sm:$0xff]  ;;  %660 = vst.msk [vmem:[#allocation3] sm:$0xff] %vm491_vm0, %v651_v27 }
 0x15f   : > { %2022 = vmatprep.subr.msk.mxu1 %vm756_vm1, %v2825_v21  ;;  %v2843_v25 = vmul.f32 0.35355338, %v2021_v20 }
 0x160   : > { %2023 = vmatpush3.xpose.msk.msra.mxu1 %vm756_vm1, %v2825_v21  ;;  %v741_v22 = vpop.f32.mrf.mxu0  ;;  %v2831_v23 = vld [vmem:[#allocation2] sm:$0xff] }
 0x161   : > { %v2833_v24 = vmul.f32 0.35355338, %v741_v22  ;;  %954 = vrot.lane.b32.xlu1 %v2831_v23, %s2534_s11  ;;  %2024 = vmatprep.subr.msk.mxu1 %vm756_vm1, %v2831_v23 }
 0x163   : > { %2026 = vmatprep.mubr.msk.f32.mxu1 %vm756_vm1, %v2833_v24  ;;  %v2851_v28 = vld [vmem:[#allocation3 + $0x8] sm:$0xff] }
 0x164   : > { %2025 = vmatpush3.xpose.msk.msra.mxu1 %vm756_vm1, %v2831_v23 }
 0x165   : > { %950 = vrot.lane.b32.xlu1 %v2833_v24, %s2534_s11  ;;  %2029 = vmatprep.subr.mxu1 %v2851_v28  ;;  %v2855_v29 = vld [vmem:[#allocation3] sm:$0xff] }
 0x167   : > { %2027 = vmatmul.mubr.msk.f32.vlgmr.msra.gmra.mxu1 %vm756_vm1, %v2843_v25 }
 0x168   : > { %2030 = vmatpush3.msra.mxu1 %v2851_v28 }
 0x169   : > { %2031 = vmatprep.subr.mxu1 %v2855_v29 }
 0x16a   : > { %2032 = vmatpush3.msra.mxu1 %v2855_v29 }
 0x1d3   : > { %v955_v45 = vpop.permute.xlu1 %954 }
 0x1d7   : > { %v951_v46 = vpop.permute.xlu1 %950 }
 0x227   : > { %v2028_v30 = vpop.f32.mrf.mxu1 }
 0x228   : > { %v848_v33 = vsel %vm844_vm2, %v2028_v30, -inf }
 0x229   : > { %v835_v31 = vpop.f32.mrf.mxu1 }
 0x22a   : > { %v845_v32 = vsel %vm844_vm2, %v835_v31, -inf }
 0x22b   : > { %846 = vmax.xlane.f32.xlu0 %v845_v32 }
 0x22f   : > { %849 = vmax.xlane.f32.xlu0 %v848_v33 }
 0x245   : > { %956 = vrot.lane.b32.xlu0 %v2825_v21, %s2534_s11 }
 0x2b4   : > { %v847_v34 = vpop.xlane.xlu0 %846 }
 0x2b5   : > { %v851_v35 = vsub.f32 %v835_v31, %v847_v34 }
 0x2b7   : > { %v853_v38 = vmul.f32 1.442695, %v851_v35 }
 0x2b8   : > { %v850_v36 = vpop.xlane.xlu0 %849 }
 0x2b9   : > { %v852_v37 = vsub.f32 %v2028_v30, %v850_v36 }
 0x2bb   : > { %v855_v39 = vmul.f32 1.442695, %v852_v37 }
 0x2bc   : > { %v957_v40 = vpop.permute.xlu0 %956 }
 0x2bd   : > { %2211 = vpow2.f32 %v855_v39  ;;  %2036 = vmatprep.subr.msk.mxu1 %vm756_vm1, %v957_v40 }
 0x2be   : > { %2213 = vpow2.f32 %v853_v38 }
 0x2ca   : > { %v2212_v41 = vpop.eup %2211 }
 0x2cb   : > { %v860_v42 = vsel %vm844_vm2, %v2212_v41, 0.0  ;;  %v2214_v43 = vpop.eup %2213 }
 0x2cc   : > { %861 = vadd.xlane.f32.xlu1 %v860_v42  ;;  %v857_v44 = vsel %vm844_vm2, %v2214_v43, 0.0 }
 0x2d0   : > { %858 = vadd.xlane.f32.xlu1 %v857_v44 }
 0x2e1   : > { %952 = vrot.lane.b32.xlu1 %v2843_v25, %s2534_s11 }
 0x355   : > { %v862_v47 = vpop.xlane.xlu1 %861 }
 0x356   : > { %2215 = vrcp.f32 %v862_v47 }
 0x359   : > { %v859_v48 = vpop.xlane.xlu1 %858 }
 0x35a   : > { %2217 = vrcp.f32 %v859_v48 }
 0x35d   : > { %v953_v53 = vpop.permute.xlu1 %952 }
 0x363   : > { %v2216_v49 = vpop.eup %2215 }
 0x364   : > { %v866_v52 = vmul.f32 %v2216_v49, %v2212_v41 }
 0x367   : > { %v2218_v50 = vpop.eup %2217 }
 0x368   : > { %v865_v51 = vmul.f32 %v2218_v50, %v2214_v43 }
 0x36a   : > { %2033 = vmatprep.mubr.msk.f32.mxu1 %vm844_vm2, %v865_v51 }
 0x36b   : > { %2034 = vmatmul.mubr.msk.f32.vlgmr.msra.gmra.mxu1 %vm844_vm2, %v866_v52 }
 0x36c   : > { %2037 = vmatpush3.xpose.msk.msra.mxu1 %vm756_vm1, %v957_v40  ;;  %2040 = vmatprep.mubr.msk.f32.mxu1 %vm756_vm1, %v951_v46 }
 0x36d   : > { %2038 = vmatprep.subr.msk.mxu1 %vm756_vm1, %v955_v45 }
 0x370   : > { %2039 = vmatpush3.xpose.msk.msra.mxu1 %vm756_vm1, %v955_v45 }
 0x373   : > { %2041 = vmatmul.mubr.msk.f32.vlgmr.msra.gmra.mxu1 %vm756_vm1, %v953_v53 }
 0x42b   : > { %v2035_v54 = vpop.f32.mrf.mxu1 }
 0x42c   : > { %949 = vst.msk [vmem:[#allocation4 + $0x8] sm:$0xff] %vm756_vm1, %v2035_v54 }
 0x42d   : > { %v939_v55 = vpop.f32.mrf.mxu1 }
 0x42e   : > { %948 = vst.msk [vmem:[#allocation4] sm:$0xff] %vm756_vm1, %v939_v55 }
 0x433   : > { %v2042_v56 = vpop.f32.mrf.mxu1 }
 0x434   : > { %v1044_v57 = vsel %vm844_vm2, %v2042_v56, -inf }
 0x435   : > { %1045 = vmax.xlane.f32.xlu1 %v1044_v57  ;;  %v1032_v58 = vpop.f32.mrf.mxu1 }
 0x436   : > { %v1041_v59 = vsel %vm844_vm2, %v1032_v58, -inf }
 0x437   : > { %1042 = vmax.xlane.f32.xlu0 %v1041_v59 }
 0x446   : > { %1065 = vrot.lane.b32.xlu1 %v2855_v29, %s2534_s11 }
 0x44a   : > { %1169 = vrot.lane.b32.xlu1 %v2825_v21, %s2535_s13 }
 0x44e   : > { %1167 = vrot.lane.b32.xlu1 %v2831_v23, %s2535_s13 }
 0x452   : > { %1165 = vrot.lane.b32.xlu1 %v2843_v25, %s2535_s13 }
 0x4be   : > { %v1046_v60 = vpop.xlane.xlu1 %1045 }
 0x4bf   : > { %v1048_v61 = vsub.f32 %v2042_v56, %v1046_v60 }
 0x4c0   : > { %v1043_v62 = vpop.xlane.xlu0 %1042 }
 0x4c1   : > { %v1051_v63 = vmul.f32 1.442695, %v1048_v61  ;;  %v1047_v0 = vsub.f32 %v1032_v58, %v1043_v62 }
 0x4c2   : > { %v1066_v8 = vpop.permute.xlu1 %1065 }
 0x4c3   : > { %2219 = vpow2.f32 %v1051_v63  ;;  %v1049_v1 = vmul.f32 1.442695, %v1047_v0 }
 0x4c5   : > { %2221 = vpow2.f32 %v1049_v1 }
 0x4c6   : > { %v1170_v10 = vpop.permute.xlu1 %1169 }
 0x4ca   : > { %v1168_v16 = vpop.permute.xlu1 %1167 }
 0x4ce   : > { %v1166_v17 = vpop.permute.xlu1 %1165 }
 0x4d0   : > { %v2220_v2 = vpop.eup %2219 }
 0x4d1   : > { %v1056_v3 = vsel %vm844_vm2, %v2220_v2, 0.0 }
 0x4d2   : > { %v2222_v4 = vpop.eup %2221  ;;  %1057 = vadd.xlane.f32.xlu0 %v1056_v3 }
 0x4d3   : > { %v1053_v5 = vsel %vm844_vm2, %v2222_v4, 0.0 }
 0x4d6   : > { %1054 = vadd.xlane.f32.xlu0 %v1053_v5 }
 0x4ec   : > { %1067 = vrot.lane.b32.xlu0 %v2851_v28, %s2534_s11 }
 0x4f0   : > { %1163 = vrot.lane.b32.xlu0 %v2833_v24, %s2535_s13 }
 0x55b   : > { %v1058_v6 = vpop.xlane.xlu0 %1057 }
 0x55c   : > { %2223 = vrcp.f32 %v1058_v6 }
 0x55f   : > { %v1055_v7 = vpop.xlane.xlu0 %1054 }
 0x560   : > { %2225 = vrcp.f32 %v1055_v7 }
 0x563   : > { %v1068_v9 = vpop.permute.xlu0 %1067 }
 0x564   : > { %2043 = vmatprep.subr.mxu0 %v1068_v9 }
 0x565   : > { %2044 = vmatpush3.msra.mxu0 %v1068_v9 }
 0x566   : > { %2045 = vmatprep.subr.mxu0 %v1066_v8 }
 0x567   : > { %2046 = vmatpush3.msra.mxu0 %v1066_v8  ;;  %v1164_v15 = vpop.permute.xlu0 %1163 }
 0x568   : > { %2050 = vmatprep.subr.msk.mxu0 %vm756_vm1, %v1170_v10 }
 0x569   : > { %v2224_v11 = vpop.eup %2223 }
 0x56a   : > { %v1062_v14 = vmul.f32 %v2224_v11, %v2220_v2  ;;  %v1589_v11 = vld [vmem:[#allocation16 + $0x10] sm:$0xff] }
 0x56d   : > { %v2226_v12 = vpop.eup %2225 }
 0x56e   : > { %v1061_v13 = vmul.f32 %v2226_v12, %v2222_v4  ;;  %v1588_v12 = vld [vmem:[#allocation16 + $0x8] sm:$0xff] }
 0x570   : > { %2047 = vmatprep.mubr.msk.f32.mxu0 %vm844_vm2, %v1061_v13  ;;  %v1587_v13 = vld [vmem:[#allocation16] sm:$0xff] }
 0x571   : > { %2048 = vmatmul.mubr.msk.f32.vlgmr.msra.gmra.mxu0 %vm844_vm2, %v1062_v14 }
 0x572   : > { %2051 = vmatpush3.xpose.msk.msra.mxu0 %vm756_vm1, %v1170_v10  ;;  %2054 = vmatprep.mubr.msk.f32.mxu0 %vm756_vm1, %v1164_v15 }
 0x573   : > { %2052 = vmatprep.subr.msk.mxu0 %vm756_vm1, %v1168_v16 }
 0x576   : > { %2053 = vmatpush3.xpose.msk.msra.mxu0 %vm756_vm1, %v1168_v16 }
 0x579   : > { %2055 = vmatmul.mubr.msk.f32.vlgmr.msra.gmra.mxu0 %vm756_vm1, %v1166_v17 }
 0x631   : > { %v2901_v18 = vpop.f32.mrf.mxu0 }
 0x633   : > { %v2903_v19 = vpop.f32.mrf.mxu0 }
 0x639   : > { %v2056_v20 = vpop.f32.mrf.mxu0 }
 0x63a   : > { %v1257_v22 = vsel %vm844_vm2, %v2056_v20, -inf }
 0x63b   : > { %1258 = vmax.xlane.f32.xlu1 %v1257_v22  ;;  %v1245_v26 = vpop.f32.mrf.mxu0 }
 0x63c   : > { %v1254_v27 = vsel %vm844_vm2, %v1245_v26, -inf }
 0x63d   : > { %1255 = vmax.xlane.f32.xlu0 %v1254_v27 }
 0x64c   : > { %1276 = vrot.lane.b32.xlu1 %v2855_v29, %s2535_s13 }
 0x650   : > { %1380 = vrot.lane.b32.xlu1 %v2825_v21, %s2536_s5 }
 0x654   : > { %1378 = vrot.lane.b32.xlu1 %v2831_v23, %s2536_s5 }
 0x658   : > { %1376 = vrot.lane.b32.xlu1 %v2843_v25, %s2536_s5 }
 0x6c4   : > { %v1259_v30 = vpop.xlane.xlu1 %1258 }
 0x6c5   : > { %v1261_v31 = vsub.f32 %v2056_v20, %v1259_v30  ;;  %v1921_v20 = vld [vmem:[%s3015_s7] ss:$0 sm:$0xff] }
 0x6c6   : > { %v1256_v32 = vpop.xlane.xlu0 %1255 }
 0x6c7   : > { %v1264_v33 = vmul.f32 1.442695, %v1261_v31  ;;  %v1260_v34 = vsub.f32 %v1245_v26, %v1256_v32 }
 0x6c8   : > { %v1277_v39 = vpop.permute.xlu1 %1276 }
 0x6c9   : > { %2227 = vpow2.f32 %v1264_v33  ;;  %v1262_v35 = vmul.f32 1.442695, %v1260_v34 }
 0x6cb   : > { %2229 = vpow2.f32 %v1262_v35 }
 0x6cc   : > { %v1381_v41 = vpop.permute.xlu1 %1380 }
 0x6d0   : > { %v1379_v46 = vpop.permute.xlu1 %1378 }
 0x6d4   : > { %v1377_v47 = vpop.permute.xlu1 %1376 }
 0x6d6   : > { %v2228_v36 = vpop.eup %2227 }
 0x6d7   : > { %v1269_v37 = vsel %vm844_vm2, %v2228_v36, 0.0 }
 0x6d8   : > { %v2230_v38 = vpop.eup %2229  ;;  %1270 = vadd.xlane.f32.xlu0 %v1269_v37 }
 0x6d9   : > { %v1266_v21 = vsel %vm844_vm2, %v2230_v38, 0.0 }
 0x6dc   : > { %1267 = vadd.xlane.f32.xlu0 %v1266_v21 }
 0x6f2   : > { %1278 = vrot.lane.b32.xlu0 %v2851_v28, %s2535_s13 }
 0x6f6   : > { %1374 = vrot.lane.b32.xlu0 %v2833_v24, %s2536_s5 }
 0x761   : > { %v1271_v23 = vpop.xlane.xlu0 %1270 }
 0x762   : > { %2231 = vrcp.f32 %v1271_v23 }
 0x765   : > { %v1268_v25 = vpop.xlane.xlu0 %1267 }
 0x766   : > { %2233 = vrcp.f32 %v1268_v25 }
 0x769   : > { %v1279_v40 = vpop.permute.xlu0 %1278 }
 0x76a   : > { %2057 = vmatprep.subr.mxu1 %v1279_v40 }
 0x76b   : > { %2058 = vmatpush3.msra.mxu1 %v1279_v40 }
 0x76c   : > { %2059 = vmatprep.subr.mxu1 %v1277_v39 }
 0x76d   : > { %2060 = vmatpush3.msra.mxu1 %v1277_v39  ;;  %v1375_v24 = vpop.permute.xlu0 %1374 }
 0x76e   : > { %2064 = vmatprep.subr.msk.mxu1 %vm756_vm1, %v1381_v41 }
 0x76f   : > { %v2232_v42 = vpop.eup %2231 }
 0x770   : > { %v1275_v45 = vmul.f32 %v2232_v42, %v2228_v36 }
 0x773   : > { %v2234_v43 = vpop.eup %2233 }
 0x774   : > { %v1274_v44 = vmul.f32 %v2234_v43, %v2230_v38 }
 0x776   : > { %2061 = vmatprep.mubr.msk.f32.mxu1 %vm844_vm2, %v1274_v44 }
 0x777   : > { %2062 = vmatmul.mubr.msk.f32.vlgmr.msra.gmra.mxu1 %vm844_vm2, %v1275_v45 }
 0x778   : > { %2065 = vmatpush3.xpose.msk.msra.mxu1 %vm756_vm1, %v1381_v41  ;;  %2068 = vmatprep.mubr.msk.f32.mxu1 %vm756_vm1, %v1375_v24 }
 0x779   : > { %2066 = vmatprep.subr.msk.mxu1 %vm756_vm1, %v1379_v46 }
 0x77c   : > { %2067 = vmatpush3.xpose.msk.msra.mxu1 %vm756_vm1, %v1379_v46 }
 0x77f   : > { %2069 = vmatmul.mubr.msk.f32.vlgmr.msra.gmra.mxu1 %vm756_vm1, %v1377_v47 }
 0x837   : > { %v2063_v48 = vpop.f32.mrf.mxu1 }
 0x839   : > { %v1354_v49 = vpop.f32.mrf.mxu1 }
 0x83f   : > { %v2070_v50 = vpop.f32.mrf.mxu1 }
 0x840   : > { %v1468_v51 = vsel %vm844_vm2, %v2070_v50, -inf }
 0x841   : > { %1469 = vmax.xlane.f32.xlu1 %v1468_v51  ;;  %v1456_v52 = vpop.f32.mrf.mxu1 }
 0x842   : > { %v1465_v53 = vsel %vm844_vm2, %v1456_v52, -inf }
 0x843   : > { %1466 = vmax.xlane.f32.xlu0 %v1465_v53 }
 0x852   : > { %1487 = vrot.lane.b32.xlu1 %v2855_v29, %s2536_s5 }
 0x856   : > { %1154 = vrot.lane.b32.xlu1 %v2903_v19, %s2537_s1 }
 0x85a   : > { %1156 = vrot.lane.b32.xlu1 %v2901_v18, %s2537_s1 }
 0x85e   : > { %1367 = vrot.lane.b32.xlu1 %v2063_v48, %s2538_s25 }
 0x8ca   : > { %v1470_v54 = vpop.xlane.xlu1 %1469 }
 0x8cb   : > { %v1472_v55 = vsub.f32 %v2070_v50, %v1470_v54 }
 0x8cc   : > { %v1467_v56 = vpop.xlane.xlu0 %1466 }
 0x8cd   : > { %v1475_v57 = vmul.f32 1.442695, %v1472_v55  ;;  %v1471_v58 = vsub.f32 %v1456_v52, %v1467_v56 }
 0x8ce   : > { %v1488_v59 = vpop.permute.xlu1 %1487 }
 0x8cf   : > { %2235 = vpow2.f32 %v1475_v57  ;;  %v1473_v60 = vmul.f32 1.442695, %v1471_v58 }
 0x8d1   : > { %2237 = vpow2.f32 %v1473_v60 }
 0x8d2   : > { %v1155_v29 = vpop.permute.xlu1 %1154 }
 0x8d3   : > { %1161 = vst.msk [vmem:[#allocation4] sm:$0xff] %vm1160_vm3, %v1155_v29 }
 0x8d6   : > { %v1157_v61 = vpop.permute.xlu1 %1156 }
 0x8d7   : > { %1162 = vst.msk [vmem:[#allocation4 + $0x8] sm:$0xff] %vm1160_vm3, %v1157_v61 }
 0x8da   : > { %v1368_v62 = vpop.permute.xlu1 %1367 }
 0x8db   : > { %1373 = vst.msk [vmem:[#allocation4 + $0x8] sm:$0xff] %vm1371_vm4, %v1368_v62 }
 0x8dc   : > { %v2236_v63 = vpop.eup %2235 }
 0x8dd   : > { %v1480_v0 = vsel %vm844_vm2, %v2236_v63, 0.0 }
 0x8de   : > { %v2238_v1 = vpop.eup %2237  ;;  %1481 = vadd.xlane.f32.xlu0 %v1480_v0 }
 0x8df   : > { %v1477_v2 = vsel %vm844_vm2, %v2238_v1, 0.0 }
 0x8e2   : > { %1478 = vadd.xlane.f32.xlu0 %v1477_v2 }
 0x8f8   : > { %1489 = vrot.lane.b32.xlu0 %v2851_v28, %s2536_s5  ;;  %v1590_v28 = vld [vmem:[#allocation16 + $0x18] sm:$0xff] }
 0x8fc   : > { %1365 = vrot.lane.b32.xlu0 %v1354_v49, %s2538_s25 }
 0x967   : > { %v1482_v3 = vpop.xlane.xlu0 %1481 }
 0x968   : > { %2239 = vrcp.f32 %v1482_v3 }
 0x96b   : > { %v1479_v4 = vpop.xlane.xlu0 %1478 }
 0x96c   : > { %2241 = vrcp.f32 %v1479_v4 }
 0x96f   : > { %v1490_v5 = vpop.permute.xlu0 %1489 }
 0x970   : > { %2071 = vmatprep.subr.mxu0 %v1490_v5 }
 0x971   : > { %2072 = vmatpush3.msra.mxu0 %v1490_v5 }
 0x972   : > { %2073 = vmatprep.subr.mxu0 %v1488_v59 }
 0x973   : > { %2074 = vmatpush3.msra.mxu0 %v1488_v59  ;;  %v1366_v6 = vpop.permute.xlu0 %1365 }
 0x974   : > { %1372 = vst.msk [vmem:[#allocation4] sm:$0xff] %vm1371_vm4, %v1366_v6  ;;  %2078 = vmatprep.subr.mxu0 %v1590_v28 }
 0x975   : > { %v2240_v7 = vpop.eup %2239 }
 0x976   : > { %v1486_v10 = vmul.f32 %v2240_v7, %v2236_v63 }
 0x979   : > { %v2242_v8 = vpop.eup %2241 }
 0x97a   : > { %v1485_v9 = vmul.f32 %v2242_v8, %v2238_v1 }
 0x97c   : > { %2075 = vmatprep.mubr.msk.f32.mxu0 %vm844_vm2, %v1485_v9 }
 0x97d   : > { %2076 = vmatmul.mubr.msk.f32.vlgmr.msra.gmra.mxu0 %vm844_vm2, %v1486_v10 }
 0x97e   : > { %2079 = vmatpush3.msra.mxu0 %v1590_v28 }
 0x97f   : > { %2080 = vmatprep.subr.mxu0 %v1589_v11 }
 0x980   : > { %2081 = vmatpush3.msra.mxu0 %v1589_v11 }
 0x981   : > { %2082 = vmatprep.subr.mxu0 %v1588_v12 }
 0x982   : > { %2083 = vmatpush3.msra.mxu0 %v1588_v12 }
 0x983   : > { %2084 = vmatprep.subr.mxu0 %v1587_v13 }
 0x984   : > { %2085 = vmatpush3.msra.mxu0 %v1587_v13 }
 0xa3d   : > { %v2077_v14 = vpop.f32.mrf.mxu0 }
 0xa3e   : > { %1578 = vrot.lane.b32.xlu1 %v2077_v14, %s2539_s16 }
 0xa3f   : > { %v1565_v15 = vpop.f32.mrf.mxu0 }
 0xa40   : > { %1576 = vrot.lane.b32.xlu0 %v1565_v15, %s2539_s16 }
 0xab0   : > { %v1579_v16 = vpop.permute.xlu1 %1578 }
 0xab1   : > { %1584 = vst.msk [vmem:[#allocation4 + $0x8] sm:$0xff] %vm1582_vm5, %v1579_v16 }
 0xab2   : > { %v1577_v17 = vpop.permute.xlu0 %1576 }
 0xab3   : > { %1583 = vst.msk [vmem:[#allocation4] sm:$0xff] %vm1582_vm5, %v1577_v17 }
 0xab8   : > { %v1586_v19 = vld [vmem:[#allocation4 + $0x8] sm:$0xff] }
 0xaba   : > { %v1585_v18 = vld [vmem:[#allocation4] sm:$0xff] }
 0xabb   : > { %2086 = vmatprep.mubr.msk.f32.mxu0 %vm491_vm0, %v1585_v18 }
 0xabc   : > { %2087 = vmatmul.mubr.msk.f32.vlgmr.msra.gmra.mxu0 %vm491_vm0, %v1586_v19 }
 0xb7c   : > { %v2088_v22 = vpop.f32.mrf.mxu0 }
 0xb7d   : > { %v1676_v26 = vadd.f32 %v2088_v22, %v1921_v20 }
 0xb7e   : > { %v1670_v27 = vpop.f32.mrf.mxu0 }
 0xb7f   : > { %1680 = vst.msk [vmem:[%s476_s23 + $0x8] sm:$0xff] %vm491_vm0, %v1676_v26  ;;  %v1671_v30 = vadd.f32 %v1921_v20, %v1670_v27 }
 0xb81   : > { %1679 = vst.msk [vmem:[%s476_s23] sm:$0xff] %vm491_vm0, %v1671_v30 }
 0xb82   : > { %2444 = shalt.err (!%p2441_p0)
}
 0xb83   : > { %s2445_s17 = scalar_lea.hbm %s2958_s20, 256  ;;  %s2449_s11 = scalar_lea.hbm %s3016_s8, 512 }
 0xb84   : > { %p2446_p11 = scmp.ne.s32.totalorder %s2958_s20, %s2445_s17  ;;  %p2450_p8 = scmp.lt.s32.totalorder %s2958_s20, %s3016_s8 }
 0xb85   : > { %p2451_p12 = scmp.lt.s32.totalorder %s2449_s11, %s2445_s17 }
 0xb86   : > { %p2447_p10 = pnand %p2446_p11, %p2684_p7 }
 0xb87   : > { %p2452_p5 = por %p2451_p12, %p2450_p8 }
 0xb88   : > { %p2448_p1 = pneg %p2447_p10 }
 0xb8a   : > { %p2453_p4 = pnand %p2452_p5, %p2448_p1 }
 0xb8c   : > { %2456 = shalt.err (!%p2453_p4)
}
 0xb8d   : > { %s2541_s25 = smov 128  }
 0xb8e   : > { %2111 = dma.vmem_to_hbm [thread:$0]  (%p2684_p7), %s2952_s18, 256, %s2958_s20, %s1682_s12, %s2541_s25, %s2541_s25, %s2537_s1  }
 0xb8f PF: > { %s3062_s16 = sld [smem:[#allocation23_spill]] }
 0xb90   : > { %s3063_s4 = sld [smem:[#allocation26_spill]] }
 0xb91   : > { %s3064_s24 = sld [smem:[#allocation25_spill]] }
 0xb95   : > { %s1712_s23 = sand.u32 1, %s3062_s16  }
 0xb96   : > { %p3065_p2 = scmp.ne.s32.totalorder %s3063_s4, 0  ;;  %s1713_s10 = scalar_lea.sflag [#allocation7], %s1712_s23 }
 0xb97   : > { %p3066_p3 = scmp.ge.s32.totalorder %s3064_s24, 2 }
 0xb99   : > { %p2137_p6 = pnand %p3066_p3, %p3065_p2 }
 0xb9b   : > { %p2138_p9 = pneg %p2137_p6 }
 0xb9d   : > { %2498 = dma.done.wait (%p2138_p9), %s1713_s10, 256  }
 0xb9e   : > { %2500 = vsyncadd (%p2138_p9), %s1713_s10, 4294967040  ;;  %s29_s10 = sadd.s32 1, %s3064_s24   ;;  %s3067_s21 = sld [smem:[#allocation28_spill]] }
 0xb9f   : > { %p26_p13 = scmp.ge.s32.totalorder %s29_s10, 4   ;;  %s3068_s30 = sld [smem:[#allocation24_spill]] }
 0xba0   : > { %s3069_s9 = sld [smem:[#allocation27_spill]]  ;;  %s3070_s27 = smov %s2507_s28 }
 0xba1   : > { %s3071_s28 = smov %s2511_s29  ;;  %28 = sbr.rel (!%p26_p13) target bundleno = 15 (0xf), region = 141 }
 0xba4   : > { %s3072_s29 = smov %s3067_s21 }
 0xba6   :  { %1718 = vsyncpa [#allocation6], 1 }
 0xba7   :  { %1720 = vsyncpa [#allocation6 + $0x1], 1 }
 0xba8   :  { %1721 = vsyncpa [#allocation9], 1 }
 0xba9   :  { %1723 = vsyncpa [#allocation9 + $0x1], 1 }
 0xbaa   :  { %1724 = vsyncpa [#allocation12], 1 }
 0xbab   :  { %1725 = vsyncpa [#allocation15], 1 }
 0xbac   :  { %1726 = vsyncpa [#allocation7], 1 }
 0xbad   :  { %1728 = vsyncpa [#allocation7 + $0x1], 1 }

</bundles_post_ra>
